<compile_context>
chip_gen: v7x
topology: tpu7x:2x2x1
jax: 0.10.0
libtpu: 0.0.40
codegen_flags: <defaults>
</compile_context>

<pallas_src>
import functools

import jax
import jax.numpy as jnp
from jax.experimental import pallas as pl
from jax.experimental.pallas import tpu as pltpu

D_HID = 32
D_FF = 64
EPS = 1e-3
LANES = 128


def _ffn_ln_kernel(x_ref, w1_ref, b1_ref, w2_ref, p_ref, m_ref, o_ref, *, d_hid):
    # Folded layout: each row of the block holds F = 128 // d_hid tokens back to
    # back, so every vector load/store is lane-dense (no masked vst).
    x = x_ref[...]                                               # (tile_r, F*d)

    # h = relu(x @ W1 + b1), per token via the block-diagonal W1_big.
    h = jnp.dot(x, w1_ref[...], preferred_element_type=jnp.float32) + b1_ref[...]
    h = jnp.maximum(h, 0.0)
    # relu_dropout is identity in eval mode.

    # out = h @ W2 + b2, then residual.
    out = jnp.dot(h, w2_ref[...], preferred_element_type=jnp.float32) + p_ref[0:1, :]
    # residual_dropout is identity in eval mode.
    y = out + x

    # LayerNormalization over each token's d_hid features.  The segmented
    # per-token reductions run on the MXU (block-diagonal ones matrix, resident)
    # which is idle once the DMA is hidden; results come back pre-broadcast.
    sums = jnp.dot(y, m_ref[...], preferred_element_type=jnp.float32)
    c = y - sums * (1.0 / d_hid)
    ss = jnp.dot(c * c, m_ref[...], preferred_element_type=jnp.float32)
    sigma = jnp.sqrt(ss * (1.0 / (d_hid - 1)))                   # unbiased std
    denom = sigma + EPS                                          # eps on sigma
    # EUP approximate reciprocal + one Newton step (error ~e^2, far below the
    # 2e-4 tolerance) keeps the divide off the VALU path.
    r = pl.reciprocal(denom, approx=True)
    r = r * (2.0 - denom * r)
    o_ref[...] = (c * r * p_ref[1:2, :] + p_ref[2:3, :]).astype(o_ref.dtype)


def _pick_tile_rows(n_rows, max_rows=2048):
    """Pick the folded-row tile: largest multiple-of-8 divisor of n_rows capped
    at max_rows (2048 rows == 8192 tokens at d_hid=32).  Small inputs run a
    single grid step (best on 1-TC v5e/v6e); when multiple steps are needed an
    even step count is preferred for v7x megacore balance."""
    if n_rows <= max_rows:
        return n_rows
    best = None
    for cand in range(max_rows, 7, -8):
        if n_rows % cand == 0:
            if (n_rows // cand) % 2 == 0:
                return cand
            if best is None:
                best = cand
    return best if best is not None else n_rows


def positionwise_feed_forward(x, w1, b1, w2, b2, gamma, beta):
    """x: (T, d_hid) f32 (flat len x d_hid, same as the PyTorch module's input).
    Weights are (in, out): w1: (d_hid, d_ff), w2: (d_ff, d_hid)."""
    T, d_hid = x.shape
    d_ff = w1.shape[1]

    # Fold F tokens per row so the lane axis is 128-wide.  This is a reshape of
    # a contiguous row-major array -> bitcast under jit, no HBM copy/transpose.
    fold = LANES // d_hid if (d_hid <= LANES and LANES % d_hid == 0) else 1
    if T % fold != 0:
        fold = 1
    rows = T // fold
    wd = fold * d_hid
    wf = fold * d_ff

    tile_r = _pick_tile_rows(rows)
    assert rows % tile_r == 0 and (tile_r == rows or tile_r % 8 == 0)

    x_fold = x.reshape(rows, wd)

    # Block-diagonal / tiled parameter prep (tiny, resident across grid steps).
    eye = jnp.eye(fold, dtype=x.dtype)
    w1_big = jnp.kron(eye, w1)                                   # (wd, wf)
    w2_big = jnp.kron(eye, w2)                                   # (wf, wd)
    b1_big = jnp.tile(b1, fold).reshape(1, wf)
    params = jnp.stack([jnp.tile(b2, fold),
                        jnp.tile(gamma, fold),
                        jnp.tile(beta, fold)], axis=0)           # (3, wd)
    m_ones = jnp.kron(eye, jnp.ones((d_hid, d_hid), x.dtype))    # (wd, wd)

    grid = (rows // tile_r,)
    out_fold = pl.pallas_call(
        functools.partial(_ffn_ln_kernel, d_hid=d_hid),
        out_shape=jax.ShapeDtypeStruct((rows, wd), x.dtype),
        grid_spec=pltpu.PrefetchScalarGridSpec(
            num_scalar_prefetch=0,
            grid=grid,
            in_specs=[
                pl.BlockSpec((tile_r, wd), lambda i: (i, 0)),    # folded x tile
                pl.BlockSpec((wd, wf), lambda i: (0, 0)),        # W1_big (resident)
                pl.BlockSpec((1, wf), lambda i: (0, 0)),         # b1 (tiled)
                pl.BlockSpec((wf, wd), lambda i: (0, 0)),        # W2_big (resident)
                pl.BlockSpec((3, wd), lambda i: (0, 0)),         # [b2 | a_2 | b_2]
                pl.BlockSpec((wd, wd), lambda i: (0, 0)),        # block-diag ones
            ],
            out_specs=pl.BlockSpec((tile_r, wd), lambda i: (i, 0)),
        ),
        compiler_params=pltpu.CompilerParams(
            dimension_semantics=("parallel",),
            # Large token tiles need more than v5e's 16 MiB scoped default;
            # 48 MiB still fits v7x's 64 MiB physical VMEM per TC.
            vmem_limit_bytes=48 * 1024 * 1024,
        ),
    )(x_fold, w1_big, b1_big, w2_big, params, m_ones)
    return out_fold.reshape(T, d_hid)                            # free reshape


def reference(x, w1, b1, w2, b2, gamma, beta):
    h = jnp.maximum(x @ w1 + b1, 0.0)
    out = h @ w2 + b2
    y = out + x
    mu = jnp.mean(y, axis=-1, keepdims=True)
    sigma = jnp.sqrt(jnp.sum((y - mu) ** 2, axis=-1, keepdims=True) / (y.shape[-1] - 1))
    ln = (y - mu) / (sigma + EPS)
    return ln * gamma + beta


if __name__ == "__main__":
    key = jax.random.PRNGKey(0)
    k_x, k_w1, k_b1, k_w2, k_b2 = jax.random.split(key, 5)

    # Flattened (len x d_hid) batch, e.g. 2 sentences x 256 tokens.
    T = 512
    x = jax.random.normal(k_x, (T, D_HID), dtype=jnp.float32)

    # Deterministic parameter init (uniform, PyTorch-Linear-like bounds).
    bound1 = 1.0 / (D_HID ** 0.5)
    bound2 = 1.0 / (D_FF ** 0.5)
    w1 = jax.random.uniform(k_w1, (D_HID, D_FF), jnp.float32, -bound1, bound1)
    b1 = jax.random.uniform(k_b1, (D_FF,), jnp.float32, -bound1, bound1)
    w2 = jax.random.uniform(k_w2, (D_FF, D_HID), jnp.float32, -bound2, bound2)
    b2 = jax.random.uniform(k_b2, (D_HID,), jnp.float32, -bound2, bound2)
    gamma = jnp.ones((D_HID,), jnp.float32)   # a_2
    beta = jnp.zeros((D_HID,), jnp.float32)   # b_2

    ffn = jax.jit(positionwise_feed_forward)  # jit so reshapes fold to bitcasts
    out = ffn(x, w1, b1, w2, b2, gamma, beta)
    out = jax.block_until_ready(out)

    ref = reference(x, w1, b1, w2, b2, gamma, beta)
    assert out.shape == (T, D_HID)
    assert jnp.allclose(out, ref, atol=2e-4, rtol=2e-4)

    # TODO(synk): FeatureDropout is stochastic and only active in training mode;
    # this kernel implements the eval-mode (identity-dropout) forward pass.
    print("KERNEL_OK")
</pallas_src>

<mosaic_0001>
module attributes {stable_mosaic.version = 11 : i64} {
  func.func @_ffn_ln_kernel(%arg0: i32, %arg1: memref<128x128xf32, #tpu.memory_space<vmem>>, %arg2: memref<128x256xf32, #tpu.memory_space<vmem>>, %arg3: memref<1x256xf32, #tpu.memory_space<vmem>>, %arg4: memref<256x128xf32, #tpu.memory_space<vmem>>, %arg5: memref<3x128xf32, #tpu.memory_space<vmem>>, %arg6: memref<128x128xf32, #tpu.memory_space<vmem>>, %arg7: memref<128x128xf32, #tpu.memory_space<vmem>>) attributes {dimension_semantics = [#tpu.dimension_semantics<parallel>], iteration_bounds = array<i64: 1>, scalar_prefetch = 0 : i64, scratch_operands = 0 : i64, tpu.core_type = #tpu.core_type<tc>, window_params = [{transform_indices = @transform_0, window_bounds = array<i64: 128, 128>}, {pipeline_mode = #tpu.pipeline_mode<synchronous>, transform_indices = @transform_1, window_bounds = array<i64: 128, 256>}, {pipeline_mode = #tpu.pipeline_mode<synchronous>, transform_indices = @transform_2, window_bounds = array<i64: 1, 256>}, {pipeline_mode = #tpu.pipeline_mode<synchronous>, transform_indices = @transform_3, window_bounds = array<i64: 256, 128>}, {pipeline_mode = #tpu.pipeline_mode<synchronous>, transform_indices = @transform_4, window_bounds = array<i64: 3, 128>}, {pipeline_mode = #tpu.pipeline_mode<synchronous>, transform_indices = @transform_5, window_bounds = array<i64: 128, 128>}, {transform_indices = @transform_6, window_bounds = array<i64: 128, 128>}]} {
    %c0 = arith.constant 0 : index
    %c0_0 = arith.constant 0 : index
    %0 = vector.load %arg1[%c0, %c0_0] : memref<128x128xf32, #tpu.memory_space<vmem>>, vector<128x128xf32>
    %c0_1 = arith.constant 0 : index
    %c0_2 = arith.constant 0 : index
    %1 = vector.load %arg2[%c0_1, %c0_2] : memref<128x256xf32, #tpu.memory_space<vmem>>, vector<128x256xf32>
    %cst = arith.constant dense<0.000000e+00> : vector<128x256xf32>
    %2 = tpu.matmul %0, %1, %cst {dimension_numbers = #tpu.dot_dimension_numbers<[1], [0], [0], [1], [0, 0, 1, 1], [], []>} : vector<128x128xf32>, vector<128x256xf32>, vector<128x256xf32> -> vector<128x256xf32>
    %c0_3 = arith.constant 0 : index
    %c0_4 = arith.constant 0 : index
    %3 = vector.load %arg3[%c0_3, %c0_4] : memref<1x256xf32, #tpu.memory_space<vmem>>, vector<1x256xf32>
    %4 = vector.broadcast %3 : vector<1x256xf32> to vector<128x256xf32>
    %5 = arith.addf %2, %4 : vector<128x256xf32>
    %cst_5 = arith.constant 0.000000e+00 : f32
    %6 = vector.broadcast %cst_5 : f32 to vector<128x256xf32>
    %7 = arith.maximumf %5, %6 : vector<128x256xf32>
    %c0_6 = arith.constant 0 : index
    %c0_7 = arith.constant 0 : index
    %8 = vector.load %arg4[%c0_6, %c0_7] : memref<256x128xf32, #tpu.memory_space<vmem>>, vector<256x128xf32>
    %cst_8 = arith.constant dense<0.000000e+00> : vector<128x128xf32>
    %9 = tpu.matmul %7, %8, %cst_8 {dimension_numbers = #tpu.dot_dimension_numbers<[1], [0], [0], [1], [0, 0, 1, 1], [], []>} : vector<128x256xf32>, vector<256x128xf32>, vector<128x128xf32> -> vector<128x128xf32>
    %c0_9 = arith.constant 0 : index
    %c0_10 = arith.constant 0 : index
    %10 = vector.load %arg5[%c0_9, %c0_10] : memref<3x128xf32, #tpu.memory_space<vmem>>, vector<1x128xf32>
    %11 = vector.broadcast %10 : vector<1x128xf32> to vector<128x128xf32>
    %12 = arith.addf %9, %11 : vector<128x128xf32>
    %13 = arith.addf %12, %0 : vector<128x128xf32>
    %c0_11 = arith.constant 0 : index
    %c0_12 = arith.constant 0 : index
    %14 = vector.load %arg6[%c0_11, %c0_12] : memref<128x128xf32, #tpu.memory_space<vmem>>, vector<128x128xf32>
    %cst_13 = arith.constant dense<0.000000e+00> : vector<128x128xf32>
    %15 = tpu.matmul %13, %14, %cst_13 {dimension_numbers = #tpu.dot_dimension_numbers<[1], [0], [0], [1], [0, 0, 1, 1], [], []>} : vector<128x128xf32>, vector<128x128xf32>, vector<128x128xf32> -> vector<128x128xf32>
    %cst_14 = arith.constant 3.125000e-02 : f32
    %16 = vector.broadcast %cst_14 : f32 to vector<128x128xf32>
    %17 = arith.mulf %15, %16 : vector<128x128xf32>
    %18 = arith.subf %13, %17 : vector<128x128xf32>
    %19 = arith.mulf %18, %18 : vector<128x128xf32>
    %c0_15 = arith.constant 0 : index
    %c0_16 = arith.constant 0 : index
    %20 = vector.load %arg6[%c0_15, %c0_16] : memref<128x128xf32, #tpu.memory_space<vmem>>, vector<128x128xf32>
    %cst_17 = arith.constant dense<0.000000e+00> : vector<128x128xf32>
    %21 = tpu.matmul %19, %20, %cst_17 {dimension_numbers = #tpu.dot_dimension_numbers<[1], [0], [0], [1], [0, 0, 1, 1], [], []>} : vector<128x128xf32>, vector<128x128xf32>, vector<128x128xf32> -> vector<128x128xf32>
    %cst_18 = arith.constant 0.0322580636 : f32
    %22 = vector.broadcast %cst_18 : f32 to vector<128x128xf32>
    %23 = arith.mulf %21, %22 : vector<128x128xf32>
    %24 = math.sqrt %23 : vector<128x128xf32>
    %cst_19 = arith.constant 1.000000e-03 : f32
    %25 = vector.broadcast %cst_19 : f32 to vector<128x128xf32>
    %26 = arith.addf %24, %25 : vector<128x128xf32>
    %27 = tpu.reciprocal %26 {approx = true} : vector<128x128xf32> -> vector<128x128xf32>
    %28 = arith.mulf %26, %27 : vector<128x128xf32>
    %cst_20 = arith.constant 2.000000e+00 : f32
    %29 = vector.broadcast %cst_20 : f32 to vector<128x128xf32>
    %30 = arith.subf %29, %28 : vector<128x128xf32>
    %31 = arith.mulf %27, %30 : vector<128x128xf32>
    %32 = arith.mulf %18, %31 : vector<128x128xf32>
    %c1 = arith.constant 1 : index
    %c0_21 = arith.constant 0 : index
    %33 = vector.load %arg5[%c1, %c0_21] : memref<3x128xf32, #tpu.memory_space<vmem>>, vector<1x128xf32>
    %34 = vector.broadcast %33 : vector<1x128xf32> to vector<128x128xf32>
    %35 = arith.mulf %32, %34 : vector<128x128xf32>
    %c2 = arith.constant 2 : index
    %c0_22 = arith.constant 0 : index
    %36 = vector.load %arg5[%c2, %c0_22] : memref<3x128xf32, #tpu.memory_space<vmem>>, vector<1x128xf32>
    %37 = vector.broadcast %36 : vector<1x128xf32> to vector<128x128xf32>
    %38 = arith.addf %35, %37 : vector<128x128xf32>
    %c0_23 = arith.constant 0 : index
    %c0_24 = arith.constant 0 : index
    %39 = vector.load %arg7[%c0_23, %c0_24] : memref<128x128xf32, #tpu.memory_space<vmem>>, vector<128x128xf32>
    tpu.vector_store %arg7[%c0_23, %c0_24], %38 {strides = array<i32>} : memref<128x128xf32, #tpu.memory_space<vmem>>, vector<128x128xf32>,
    return
  }
  func.func @transform_0(%arg0: i32) -> (i32, i32) {
    %c0_i32 = arith.constant 0 : i32
    %c0_i32_0 = arith.constant 0 : i32
    return %arg0, %c0_i32 : i32, i32
  }
  func.func @transform_1(%arg0: i32) -> (i32, i32) {
    %c0_i32 = arith.constant 0 : i32
    %c0_i32_0 = arith.constant 0 : i32
    %c0_i32_1 = arith.constant 0 : i32
    return %c0_i32, %c0_i32_0 : i32, i32
  }
  func.func @transform_2(%arg0: i32) -> (i32, i32) {
    %c0_i32 = arith.constant 0 : i32
    %c0_i32_0 = arith.constant 0 : i32
    %c0_i32_1 = arith.constant 0 : i32
    return %c0_i32, %c0_i32_0 : i32, i32
  }
  func.func @transform_3(%arg0: i32) -> (i32, i32) {
    %c0_i32 = arith.constant 0 : i32
    %c0_i32_0 = arith.constant 0 : i32
    %c0_i32_1 = arith.constant 0 : i32
    return %c0_i32, %c0_i32_0 : i32, i32
  }
  func.func @transform_4(%arg0: i32) -> (i32, i32) {
    %c0_i32 = arith.constant 0 : i32
    %c0_i32_0 = arith.constant 0 : i32
    %c0_i32_1 = arith.constant 0 : i32
    return %c0_i32, %c0_i32_0 : i32, i32
  }
  func.func @transform_5(%arg0: i32) -> (i32, i32) {
    %c0_i32 = arith.constant 0 : i32
    %c0_i32_0 = arith.constant 0 : i32
    %c0_i32_1 = arith.constant 0 : i32
    return %c0_i32, %c0_i32_0 : i32, i32
  }
  func.func @transform_6(%arg0: i32) -> (i32, i32) {
    %c0_i32 = arith.constant 0 : i32
    %c0_i32_0 = arith.constant 0 : i32
    return %arg0, %c0_i32 : i32, i32
  }
}

</mosaic_0001>

<bundles_post_ra>
// kernel: tile.28
= control target key start
LH: loop header
LB: loop body
LE: loop exit
PB: predicated region body
PF: predicated region fallthrough
CT: control target
= control target key end

     0   :  { %s22_s0 = inlined_call_operand.vmem [shape: f32[32], index: 0, kind: input, shape index: {}]   ;;  %s23_s1 = inlined_call_operand.vmem [shape: f32[4,32], index: 1, kind: output, shape index: {}]  }
   0x1   :  { %v4_v0 = vld [vmem:[%s22_s0] ss:$0 sm:$0xff] }
   0x2   :  { %5 = vst [vmem:[%s23_s1] sm:$0xf] %v4_v0 }

// kernel: tile.37
= control target key start
LH: loop header
LB: loop body
LE: loop exit
PB: predicated region body
PF: predicated region fallthrough
CT: control target
= control target key end

     0   :  { %vm7_vm0 = vcmask 261120   ;;  %s37_s8 = smov 32   ;;  %s38_s9 = smov 64   ;;  %vm13_vm1 = vcmask 1048320   ;;  %vm19_vm2 = vcmask 785920   ;;  %vm25_vm3 = vcmask 523520   ;;  %s55_s0 = inlined_call_operand.vmem [shape: f32[4,32], index: 0, kind: input, shape index: {}]   ;;  %s56_s1 = inlined_call_operand.vmem [shape: f32[1,128], index: 1, kind: output, shape index: {}]  }
   0x1   :  { %v4_v0 = vld [vmem:[%s55_s0] sm:$0xf]  ;;  %s36_s0 = smov 96  }
   0x2   :  { %5 = vst [vmem:[#allocation1] sm:$0xf] %v4_v0 }
   0x9   :  { %v10_v1 = vld [vmem:[#allocation1 + $0x3] sm:$0x1]   ;;  %v22_v2 = vld [vmem:[#allocation1 + $0x1] sm:$0x1]   ;;  %v6_v3 = vld [vmem:[#allocation1] sm:$0x1]  }
   0xa   :  { %11 = vrot.lane.b32.xlu0 %v10_v1, %s36_s0  ;;  %23 = vrot.lane.b32.xlu1 %v22_v2, %s37_s8  ;;  %v16_v4 = vld [vmem:[#allocation1 + $0x2] sm:$0x1]   ;;  %8 = vst.msk [vmem:[#allocation0] sm:$0x1] %vm7_vm0, %v6_v3  }
   0xe   :  { %17 = vrot.lane.b32.xlu0 %v16_v4, %s38_s9 }
  0x7c   :  { %v12_v5 = vpop.permute.xlu0 %11   ;;  %v24_v6 = vpop.permute.xlu1 %23  }
  0x7d   :  { %14 = vst.msk [vmem:[#allocation0] sm:$0x1] %vm13_vm1, %v12_v5  }
  0x80   :  { %v18_v7 = vpop.permute.xlu0 %17  }
  0x81   :  { %20 = vst.msk [vmem:[#allocation0] sm:$0x1] %vm19_vm2, %v18_v7  }
  0x82   :  { %26 = vst.msk [vmem:[#allocation0] sm:$0x1] %vm25_vm3, %v24_v6  }
  0x89   :  { %v30_v8 = vld [vmem:[#allocation0] sm:$0x1] }
  0x8a   :  { %32 = vst [vmem:[%s56_s1] sm:$0x1] %v30_v8 }

// kernel: tile.23
= control target key start
LH: loop header
LB: loop body
LE: loop exit
PB: predicated region body
PF: predicated region fallthrough
CT: control target
= control target key end

     0   :  { %s22_s0 = inlined_call_operand.vmem [shape: f32[64], index: 0, kind: input, shape index: {}]   ;;  %s23_s1 = inlined_call_operand.vmem [shape: f32[4,64], index: 1, kind: output, shape index: {}]  }
   0x1   :  { %v4_v0 = vld [vmem:[%s22_s0] ss:$0 sm:$0xff] }
   0x2   :  { %5 = vst [vmem:[%s23_s1] sm:$0xf] %v4_v0 }

// kernel: tile.24
= control target key start
LH: loop header
LB: loop body
LE: loop exit
PB: predicated region body
PF: predicated region fallthrough
CT: control target
= control target key end

     0   :  { %s6_s8 = smov 3  ;;  %vm8_vm0 = vcmask 523264   ;;  %s30_s9 = smov 64   ;;  %vm15_vm1 = vcmask 1048064   ;;  %s50_s0 = inlined_call_operand.vmem [shape: f32[4,64], index: 0, kind: input, shape index: {}]   ;;  %s51_s1 = inlined_call_operand.vmem [shape: f32[1,256], index: 1, kind: output, shape index: {}]  }
   0x1   :  { %v4_v0 = vld [vmem:[%s50_s0] sm:$0xf]  ;;  %s11_s0 = smov 3 }
   0x2   :  { %5 = vst [vmem:[#allocation1] sm:$0xf] %v4_v0 }
   0x9   :  { %v12_v1 = vld [vmem:[#allocation1 + $0x1] ss:$2 sm:%s11_s0]   ;;  %v7_v2 = vld [vmem:[#allocation1] ss:$2 sm:%s6_s8]  }
   0xa   :  { %13 = vrot.lane.b32.xlu0 %v12_v1, %s30_s9  ;;  %9 = vst.msk [vmem:[#allocation0] ss:$8 sm:$0x3] %vm8_vm0, %v7_v2  }
  0x7c   :  { %v14_v3 = vpop.permute.xlu0 %13  }
  0x7d   :  { %16 = vst.msk [vmem:[#allocation0] ss:$8 sm:$0x3] %vm15_vm1, %v14_v3  }
  0x84   :  { %v20_v4 = vld [vmem:[#allocation0] sm:$0x1]  ;;  %v24_v5 = vld [vmem:[#allocation0 + $0x8] sm:$0x1] }
  0x85   :  { %22 = vst [vmem:[%s51_s1] sm:$0x1] %v20_v4  ;;  %28 = vst [vmem:[%s51_s1 + $0x1] sm:$0x1] %v24_v5 }

// kernel: positionwise_feed_forward.1
= control target key start
LH: loop header
LB: loop body
LE: loop exit
PB: predicated region body
PF: predicated region fallthrough
CT: control target
= control target key end

     0   :  { %v1566_v3 = vmov 0.0   ;;  %s2380_s1 = inlined_call_operand.vmem [shape: f32[128,256], index: 1, kind: input, shape index: {}]   ;;  %s2381_s3 = inlined_call_operand.vmem [shape: f32[256,128], index: 3, kind: input, shape index: {}]   ;;  %s2382_s0 = inlined_call_operand.vmem [shape: f32[128,128], index: 0, kind: input, shape index: {}]   ;;  %s2383_s5 = inlined_call_operand.vmem [shape: f32[128,128], index: 5, kind: input, shape index: {}]   ;;  %s2384_s2 = inlined_call_operand.vmem [shape: f32[1,256], index: 2, kind: input, shape index: {}]   ;;  %s2385_s4 = inlined_call_operand.vmem [shape: f32[3,128], index: 4, kind: input, shape index: {}]   ;;  %s2386_s6 = inlined_call_operand.vmem [shape: f32[128,128], index: 6, kind: output, shape index: {}]  }
   0x1   :  { %v40_v0 = vld [vmem:[%s2380_s1 + $0x8] sm:$0xff]  ;;  %v42_v1 = vld [vmem:[%s2380_s1 + $0x18] sm:$0xff]  ;;  %v39_v2 = vld [vmem:[%s2380_s1] sm:$0xff]  ;;  %147 = vmatprep.mubr.f32.mxu0 %v1566_v3 }
   0x2   :  { %v1373_v4 = vpack.c.bf16 %v42_v1, %v40_v0  ;;  %v41_v5 = vld [vmem:[%s2380_s1 + $0x10] sm:$0xff]  ;;  %v44_v6 = vld [vmem:[%s2380_s1 + $0x28] sm:$0xff]  ;;  %v46_v7 = vld [vmem:[%s2380_s1 + $0x38] sm:$0xff] }
   0x3   :  { %v1375_v8 = vpack.c.bf16 %v41_v5, %v39_v2  ;;  %v1377_v9 = vpack.c.bf16 %v46_v7, %v44_v6  ;;  %v43_v10 = vld [vmem:[%s2380_s1 + $0x20] sm:$0xff]  ;;  %v45_v11 = vld [vmem:[%s2380_s1 + $0x30] sm:$0xff]  ;;  %v48_v12 = vld [vmem:[%s2380_s1 + $0x48] sm:$0xff] }
   0x4   :  { %1374 = vmatprep.subr.bf16.mxu0 %v1373_v4  ;;  %v50_v13 = vld [vmem:[%s2380_s1 + $0x58] sm:$0xff]  ;;  %v1379_v14 = vpack.c.bf16 %v45_v11, %v43_v10  ;;  %v47_v16 = vld [vmem:[%s2380_s1 + $0x40] sm:$0xff]  ;;  %v49_v17 = vld [vmem:[%s2380_s1 + $0x50] sm:$0xff] }
   0x5   :  { %1376 = vmatpush1.bf16.msra.mxu0 %v1375_v8  ;;  %v1381_v15 = vpack.c.bf16 %v50_v13, %v48_v12  ;;  %v52_v18 = vld [vmem:[%s2380_s1 + $0x68] sm:$0xff]  ;;  %v54_v19 = vld [vmem:[%s2380_s1 + $0x78] sm:$0xff]  ;;  %v1383_v20 = vpack.c.bf16 %v49_v17, %v47_v16  ;;  %v51_v22 = vld [vmem:[%s2380_s1 + $0x60] sm:$0xff] }
   0x6   :  { %1378 = vmatprep.subr.bf16.mxu0 %v1377_v9  ;;  %v1385_v21 = vpack.c.bf16 %v54_v19, %v52_v18  ;;  %v53_v23 = vld [vmem:[%s2380_s1 + $0x70] sm:$0xff]  ;;  %v56_v24 = vld [vmem:[%s2380_s1 + $0x88] sm:$0xff]  ;;  %v58_v25 = vld [vmem:[%s2380_s1 + $0x98] sm:$0xff] }
   0x7   :  { %v1387_v26 = vpack.c.bf16 %v53_v23, %v51_v22  ;;  %v1389_v27 = vpack.c.bf16 %v58_v25, %v56_v24  ;;  %v55_v28 = vld [vmem:[%s2380_s1 + $0x80] sm:$0xff]  ;;  %v57_v29 = vld [vmem:[%s2380_s1 + $0x90] sm:$0xff]  ;;  %v60_v30 = vld [vmem:[%s2380_s1 + $0xa8] sm:$0xff] }
   0x8   :  { %v62_v31 = vld [vmem:[%s2380_s1 + $0xb8] sm:$0xff]  ;;  %v59_v32 = vld [vmem:[%s2380_s1 + $0xa0] sm:$0xff]  ;;  %v61_v33 = vld [vmem:[%s2380_s1 + $0xb0] sm:$0xff]  ;;  %v1391_v34 = vpack.c.bf16 %v57_v29, %v55_v28 }
   0x9   :  { %1380 = vmatpush1.bf16.msra.mxu0 %v1379_v14  ;;  %v64_v35 = vld [vmem:[%s2380_s1 + $0xc8] sm:$0xff]  ;;  %v66_v36 = vld [vmem:[%s2380_s1 + $0xd8] sm:$0xff]  ;;  %v292_v37 = vld [vmem:[%s2381_s3 + $0x80] sm:$0xff]  ;;  %v1393_v40 = vpack.c.bf16 %v62_v31, %v60_v30  ;;  %v1395_v51 = vpack.c.bf16 %v61_v33, %v59_v32 }
   0xa   :  { %1382 = vmatprep.subr.bf16.mxu0 %v1381_v15  ;;  %v293_v38 = vld [vmem:[%s2381_s3 + $0x88] sm:$0xff]  ;;  %v276_v39 = vld [vmem:[%s2381_s3] sm:$0xff]  ;;  %v294_v43 = vld [vmem:[%s2381_s3 + $0x90] sm:$0xff]  ;;  %v1397_v55 = vpack.c.bf16 %v66_v36, %v64_v35 }
   0xb   :  { %v1405_v41 = vpack.c.bf16 %v293_v38, %v292_v37  ;;  %v277_v42 = vld [vmem:[%s2381_s3 + $0x8] sm:$0xff]  ;;  %v295_v44 = vld [vmem:[%s2381_s3 + $0x98] sm:$0xff]  ;;  %v278_v47 = vld [vmem:[%s2381_s3 + $0x10] sm:$0xff] }
   0xc   :  { %v1407_v45 = vpack.c.bf16 %v277_v42, %v276_v39  ;;  %v1409_v46 = vpack.c.bf16 %v295_v44, %v294_v43  ;;  %v279_v48 = vld [vmem:[%s2381_s3 + $0x18] sm:$0xff]  ;;  %v296_v49 = vld [vmem:[%s2381_s3 + $0xa0] sm:$0xff]  ;;  %v297_v50 = vld [vmem:[%s2381_s3 + $0xa8] sm:$0xff] }
   0xd   :  { %1384 = vmatpush1.bf16.msra.mxu0 %v1383_v20  ;;  %1406 = vmatprep.subr.bf16.mxu1 %v1405_v41  ;;  %v63_v52 = vld [vmem:[%s2380_s1 + $0xc0] sm:$0xff]  ;;  %v65_v53 = vld [vmem:[%s2380_s1 + $0xd0] sm:$0xff]  ;;  %v1411_v54 = vpack.c.bf16 %v279_v48, %v278_v47  ;;  %v68_v56 = vld [vmem:[%s2380_s1 + $0xe8] sm:$0xff]  ;;  %v1413_v57 = vpack.c.bf16 %v297_v50, %v296_v49 }
   0xe   :  { %1386 = vmatprep.subr.bf16.mxu0 %v1385_v21  ;;  %1408 = vmatpush3.bf16.msra.mxu1 %v1407_v45  ;;  %v280_v58 = vld [vmem:[%s2381_s3 + $0x20] sm:$0xff]  ;;  %v281_v59 = vld [vmem:[%s2381_s3 + $0x28] sm:$0xff]  ;;  %v70_v60 = vld [vmem:[%s2380_s1 + $0xf8] sm:$0xff]  ;;  %v1399_v63 = vpack.c.bf16 %v65_v53, %v63_v52 }
   0xf   :  { %1410 = vmatprep.subr.bf16.mxu1 %v1409_v46  ;;  %v298_v61 = vld [vmem:[%s2381_s3 + $0xb0] sm:$0xff]  ;;  %v299_v62 = vld [vmem:[%s2381_s3 + $0xb8] sm:$0xff]  ;;  %v67_v0 = vld [vmem:[%s2380_s1 + $0xe0] sm:$0xff]  ;;  %v1415_v1 = vpack.c.bf16 %v281_v59, %v280_v58  ;;  %v1401_v2 = vpack.c.bf16 %v70_v60, %v68_v56 }
  0x10   :  { %v69_v4 = vld [vmem:[%s2380_s1 + $0xf0] sm:$0xff]  ;;  %v1417_v5 = vpack.c.bf16 %v299_v62, %v298_v61  ;;  %v283_v7 = vld [vmem:[%s2381_s3 + $0x38] sm:$0xff]  ;;  %v300_v8 = vld [vmem:[%s2381_s3 + $0xc0] sm:$0xff] }
  0x11   :  { %1388 = vmatpush1.bf16.msra.mxu0 %v1387_v26  ;;  %v282_v6 = vld [vmem:[%s2381_s3 + $0x30] sm:$0xff]  ;;  %v301_v9 = vld [vmem:[%s2381_s3 + $0xc8] sm:$0xff]  ;;  %v1403_v10 = vpack.c.bf16 %v69_v4, %v67_v0  ;;  %v284_v13 = vld [vmem:[%s2381_s3 + $0x40] sm:$0xff]  ;;  %v73_v0 = vlaneseq }
  0x12   :  { %1390 = vmatprep.subr.bf16.mxu0 %v1389_v27  ;;  %1412 = vmatpush3.bf16.msra.mxu1 %v1411_v54  ;;  %v1419_v11 = vpack.c.bf16 %v283_v7, %v282_v6  ;;  %v1421_v12 = vpack.c.bf16 %v301_v9, %v300_v8  ;;  %v285_v14 = vld [vmem:[%s2381_s3 + $0x48] sm:$0xff]  ;;  %v302_v15 = vld [vmem:[%s2381_s3 + $0xd0] sm:$0xff]  ;;  %v303_v16 = vld [vmem:[%s2381_s3 + $0xd8] sm:$0xff] }
  0x13   :  { %1414 = vmatprep.subr.bf16.mxu1 %v1413_v57  ;;  %v1768_v17 = vld [vmem:[%s2382_s0] sm:$0xff]  ;;  %v1423_v18 = vpack.c.bf16 %v285_v14, %v284_v13  ;;  %v1425_v19 = vpack.c.bf16 %v303_v16, %v302_v15  ;;  %v286_v20 = vld [vmem:[%s2381_s3 + $0x50] sm:$0xff]  ;;  %v287_v21 = vld [vmem:[%s2381_s3 + $0x58] sm:$0xff] }
  0x14   :  { %v304_v22 = vld [vmem:[%s2381_s3 + $0xe0] sm:$0xff]  ;;  %v305_v23 = vld [vmem:[%s2381_s3 + $0xe8] sm:$0xff]  ;;  %v1427_v25 = vpack.c.bf16 %v287_v21, %v286_v20  ;;  %v1794_v27 = vld [vmem:[%s2382_s0 + $0x10] sm:$0xff] }
  0x15   :  { %1392 = vmatpush1.bf16.msra.mxu0 %v1391_v34  ;;  %v1787_v24 = vld [vmem:[%s2382_s0 + $0x8] sm:$0xff]  ;;  %v1429_v26 = vpack.c.bf16 %v305_v23, %v304_v22  ;;  %v1801_v28 = vld [vmem:[%s2382_s0 + $0x18] sm:$0xff]  ;;  %v1808_v29 = vld [vmem:[%s2382_s0 + $0x20] sm:$0xff] }
  0x16   :  { %1394 = vmatprep.subr.bf16.mxu0 %v1393_v40  ;;  %1416 = vmatpush3.bf16.msra.mxu1 %v1415_v1  ;;  %v1815_v30 = vld [vmem:[%s2382_s0 + $0x28] sm:$0xff]  ;;  %v1822_v31 = vld [vmem:[%s2382_s0 + $0x30] sm:$0xff]  ;;  %v1829_v32 = vld [vmem:[%s2382_s0 + $0x38] sm:$0xff]  ;;  %v74_v1 = vshrl.u32 %v73_v0, 7 }
  0x17   :  { %1418 = vmatprep.subr.bf16.mxu1 %v1417_v5  ;;  %v1836_v33 = vld [vmem:[%s2382_s0 + $0x40] sm:$0xff]  ;;  %v1843_v34 = vld [vmem:[%s2382_s0 + $0x48] sm:$0xff]  ;;  %v1850_v35 = vld [vmem:[%s2382_s0 + $0x50] sm:$0xff] }
  0x18   :  { %v1857_v36 = vld [vmem:[%s2382_s0 + $0x58] sm:$0xff]  ;;  %v1864_v37 = vld [vmem:[%s2382_s0 + $0x60] sm:$0xff]  ;;  %v1871_v38 = vld [vmem:[%s2382_s0 + $0x68] sm:$0xff]  ;;  %v79_v5 = vsub.s32 1, %v74_v1 }
  0x19   :  { %1396 = vmatpush1.bf16.msra.mxu0 %v1395_v51  ;;  %v1878_v39 = vld [vmem:[%s2382_s0 + $0x70] sm:$0xff]  ;;  %v1885_v40 = vld [vmem:[%s2382_s0 + $0x78] sm:$0xff]  ;;  %v288_v41 = vld [vmem:[%s2381_s3 + $0x60] sm:$0xff] }
  0x1a   :  { %1398 = vmatprep.subr.bf16.mxu0 %v1397_v55  ;;  %1420 = vmatpush3.bf16.msra.mxu1 %v1419_v11  ;;  %v289_v42 = vld [vmem:[%s2381_s3 + $0x68] sm:$0xff]  ;;  %v307_v44 = vld [vmem:[%s2381_s3 + $0xf8] sm:$0xff]  ;;  %v290_v46 = vld [vmem:[%s2381_s3 + $0x70] sm:$0xff] }
  0x1b   :  { %1422 = vmatprep.subr.bf16.mxu1 %v1421_v12  ;;  %v1431_v43 = vpack.c.bf16 %v289_v42, %v288_v41  ;;  %v291_v47 = vld [vmem:[%s2381_s3 + $0x78] sm:$0xff]  ;;  %v474_v49 = vld [vmem:[%s2383_s5] sm:$0xff]  ;;  %v475_v50 = vld [vmem:[%s2383_s5 + $0x8] sm:$0xff] }
  0x1c   :  { %v1435_v48 = vpack.c.bf16 %v291_v47, %v290_v46  ;;  %v476_v51 = vld [vmem:[%s2383_s5 + $0x10] sm:$0xff]  ;;  %v1437_v52 = vpack.c.bf16 %v475_v50, %v474_v49  ;;  %v477_v53 = vld [vmem:[%s2383_s5 + $0x18] sm:$0xff]  ;;  %v478_v55 = vld [vmem:[%s2383_s5 + $0x20] sm:$0xff] }
  0x1d   :  { %1400 = vmatpush1.bf16.msra.mxu0 %v1399_v63  ;;  %v1441_v54 = vpack.c.bf16 %v477_v53, %v476_v51  ;;  %v479_v56 = vld [vmem:[%s2383_s5 + $0x28] sm:$0xff]  ;;  %v480_v58 = vld [vmem:[%s2383_s5 + $0x30] sm:$0xff]  ;;  %v481_v59 = vld [vmem:[%s2383_s5 + $0x38] sm:$0xff] }
  0x1e   :  { %1402 = vmatprep.subr.bf16.mxu0 %v1401_v2  ;;  %1424 = vmatpush3.bf16.msra.mxu1 %v1423_v18  ;;  %v1445_v57 = vpack.c.bf16 %v479_v56, %v478_v55  ;;  %v1449_v60 = vpack.c.bf16 %v481_v59, %v480_v58  ;;  %v482_v61 = vld [vmem:[%s2383_s5 + $0x40] sm:$0xff]  ;;  %v483_v62 = vld [vmem:[%s2383_s5 + $0x48] sm:$0xff]  ;;  %v75_v2 = vsub.s32 0, %v74_v1 }
  0x1f   :  { %1426 = vmatprep.subr.bf16.mxu1 %v1425_v19  ;;  %v1936_v63 = vpack.c.bf16 %v483_v62, %v482_v61  ;;  %v71_v4 = vld [vmem:[%s2384_s2] sm:$0x3] }
  0x20   :  { %v1943_v6 = vrot.slane %v71_v4, %v75_v2  ;;  %v1945_v7 = vrot.slane %v71_v4, %v79_v5 }
  0x21   :  { %1404 = vmatpush1.bf16.msra.mxu0 %v1403_v10 }
  0x22   :  { %1428 = vmatpush3.bf16.msra.mxu1 %v1427_v25  ;;  %1438 = vmatprep.subr.bf16.mxu0 %v1437_v52 }
  0x23   :  { %1430 = vmatprep.subr.bf16.mxu1 %v1429_v26 }
  0x24   :  { %148 = vmatmul.mubr.f32.vlgmr.msra.gmra.mrb[0].mxu0 %v1768_v17 }
  0x25   :  { %153 = vmatprep.mubr.f32.mxu0 %v1566_v3  ;;  %1440 = vmatpush3.bf16.msra.mxu0 %v1437_v52 }
  0x26   :  { %1432 = vmatpush3.bf16.msra.mxu1 %v1431_v43  ;;  %1442 = vmatprep.subr.bf16.mxu0 %v1441_v54 }
  0x28   :  { %154 = vmatmul.mubr.f32.gmra.mrb[2].mxu0 %v1787_v24 }
  0x29   :  { %159 = vmatprep.mubr.f32.mxu0 %v1566_v3  ;;  %1444 = vmatpush3.bf16.msra.mxu0 %v1441_v54 }
  0x2a   :  { %1446 = vmatprep.subr.bf16.mxu0 %v1445_v57 }
  0x2c   :  { %160 = vmatmul.mubr.f32.gmra.mrb[4].mxu0 %v1794_v27 }
  0x2d   :  { %165 = vmatprep.mubr.f32.mxu0 %v1566_v3  ;;  %1448 = vmatpush3.bf16.msra.mxu0 %v1445_v57 }
  0x2e   :  { %1450 = vmatprep.subr.bf16.mxu0 %v1449_v60 }
  0x30   :  { %166 = vmatmul.mubr.f32.gmra.mrb[6].mxu0 %v1801_v28 }
  0x31   :  { %171 = vmatprep.mubr.f32.mxu0 %v1566_v3  ;;  %1452 = vmatpush3.bf16.msra.mxu0 %v1449_v60 }
  0x32   :  { %1454 = vmatprep.subr.bf16.mxu0 %v1936_v63 }
  0x34   :  { %172 = vmatmul.mubr.f32.gmra.mrb[8].mxu0 %v1808_v29 }
  0x35   :  { %177 = vmatprep.mubr.f32.mxu0 %v1566_v3  ;;  %1456 = vmatpush3.bf16.msra.mxu0 %v1936_v63 }
  0x38   :  { %178 = vmatmul.mubr.f32.gmra.mrb[10].mxu0 %v1815_v30 }
  0x39   :  { %183 = vmatprep.mubr.f32.mxu0 %v1566_v3 }
  0x3c   :  { %184 = vmatmul.mubr.f32.gmra.mrb[12].mxu0 %v1822_v31 }
  0x3d   :  { %189 = vmatprep.mubr.f32.mxu0 %v1566_v3 }
  0x40   :  { %190 = vmatmul.mubr.f32.gmra.mrb[14].mxu0 %v1829_v32 }
  0x41   :  { %195 = vmatprep.mubr.f32.mxu0 %v1566_v3 }
  0x44   :  { %196 = vmatmul.mubr.f32.gmra.mrb[16].mxu0 %v1836_v33 }
  0x45   :  { %201 = vmatprep.mubr.f32.mxu0 %v1566_v3 }
  0x48   :  { %202 = vmatmul.mubr.f32.gmra.mrb[18].mxu0 %v1843_v34 }
  0x49   :  { %207 = vmatprep.mubr.f32.mxu0 %v1566_v3 }
  0x4c   :  { %208 = vmatmul.mubr.f32.gmra.mrb[20].mxu0 %v1850_v35 }
  0x4d   :  { %213 = vmatprep.mubr.f32.mxu0 %v1566_v3 }
  0x50   :  { %214 = vmatmul.mubr.f32.gmra.mrb[22].mxu0 %v1857_v36 }
  0x51   :  { %219 = vmatprep.mubr.f32.mxu0 %v1566_v3 }
  0x54   :  { %220 = vmatmul.mubr.f32.gmra.mrb[24].mxu0 %v1864_v37 }
  0x55   :  { %225 = vmatprep.mubr.f32.mxu0 %v1566_v3 }
  0x58   :  { %226 = vmatmul.mubr.f32.gmra.mrb[26].mxu0 %v1871_v38 }
  0x59   :  { %231 = vmatprep.mubr.f32.mxu0 %v1566_v3 }
  0x5c   :  { %232 = vmatmul.mubr.f32.gmra.mrb[28].mxu0 %v1878_v39 }
  0x5d   :  { %237 = vmatprep.mubr.f32.mxu0 %v1566_v3  ;;  %v306_v3 = vld [vmem:[%s2381_s3 + $0xf0] sm:$0xff] }
  0x5e   :  { %v1433_v45 = vpack.c.bf16 %v307_v44, %v306_v3 }
  0x60   :  { %238 = vmatmul.mubr.f32.gmra.mrb[30].mxu0 %v1885_v40  ;;  %1434 = vmatprep.subr.bf16.mxu1 %v1433_v45 }
  0x61   :  { %1436 = vmatpush3.bf16.msra.mxu1 %v1435_v48 }
  0x62   :  { %1470 = vmatprep.subr.bf16.mxu1 %v1437_v52 }
  0xf7   :  { %v149_v8 = vpop.f32.mrb[0].mxu0 }
  0xf8   :  { %v150_v9 = vadd.f32 %v149_v8, %v1943_v6  ;;  %v151_v10 = vpop.f32.mrb[1].mxu0 }
  0xf9   :  { %v152_v11 = vadd.f32 %v151_v10, %v1945_v7 }
  0xfa   :  { %v244_v14 = vmax.f32 %v150_v9, 0.0 }
  0xfb   :  { %v155_v12 = vpop.f32.mrb[2].mxu0  ;;  %v245_v13 = vmax.f32 %v152_v11, 0.0 }
  0xfc   :  { %v156_v15 = vadd.f32 %v155_v12, %v1943_v6  ;;  %v157_v16 = vpop.f32.mrb[3].mxu0 }
  0xfd   :  { %v158_v18 = vadd.f32 %v157_v16, %v1945_v7  ;;  %377 = vmatprep.mubr.f32.mxu1 %v245_v13 }
  0xfe   :  { %378 = vmatmul.mubr.f32.vlgmr.msra.gmra.mrb[0].mxu1 %v244_v14  ;;  %v246_v21 = vmax.f32 %v156_v15, 0.0 }
  0xff   :  { %v247_v19 = vmax.f32 %v158_v18, 0.0  ;;  %v161_v20 = vpop.f32.mrb[4].mxu0  ;;  %1472 = vmatpush3.bf16.msra.mxu1 %v1437_v52 }
 0x100   :  { %v162_v22 = vadd.f32 %v161_v20, %v1943_v6  ;;  %v163_v23 = vpop.f32.mrb[5].mxu0  ;;  %1474 = vmatprep.subr.bf16.mxu1 %v1441_v54 }
 0x101   :  { %v164_v25 = vadd.f32 %v163_v23, %v1945_v7  ;;  %382 = vmatprep.mubr.f32.mxu1 %v247_v19 }
 0x102   :  { %383 = vmatmul.mubr.f32.gmra.mrb[2].mxu1 %v246_v21  ;;  %v248_v42 = vmax.f32 %v162_v22, 0.0 }
 0x103   :  { %v249_v26 = vmax.f32 %v164_v25, 0.0  ;;  %v167_v41 = vpop.f32.mrb[6].mxu0  ;;  %1476 = vmatpush3.bf16.msra.mxu1 %v1441_v54 }
 0x104   :  { %v168_v43 = vadd.f32 %v167_v41, %v1943_v6  ;;  %v169_v3 = vpop.f32.mrb[7].mxu0  ;;  %1478 = vmatprep.subr.bf16.mxu1 %v1445_v57 }
 0x105   :  { %v170_v44 = vadd.f32 %v169_v3, %v1945_v7  ;;  %387 = vmatprep.mubr.f32.mxu1 %v249_v26 }
 0x106   :  { %388 = vmatmul.mubr.f32.gmra.mrb[4].mxu1 %v248_v42  ;;  %v250_v47 = vmax.f32 %v168_v43, 0.0 }
 0x107   :  { %v251_v45 = vmax.f32 %v170_v44, 0.0  ;;  %v173_v46 = vpop.f32.mrb[8].mxu0  ;;  %1480 = vmatpush3.bf16.msra.mxu1 %v1445_v57 }
 0x108   :  { %v174_v48 = vadd.f32 %v173_v46, %v1943_v6  ;;  %v175_v49 = vpop.f32.mrb[9].mxu0  ;;  %1482 = vmatprep.subr.bf16.mxu1 %v1449_v60 }
 0x109   :  { %v176_v50 = vadd.f32 %v175_v49, %v1945_v7  ;;  %392 = vmatprep.mubr.f32.mxu1 %v251_v45 }
 0x10a   :  { %393 = vmatmul.mubr.f32.gmra.mrb[6].mxu1 %v250_v47  ;;  %v252_v53 = vmax.f32 %v174_v48, 0.0 }
 0x10b   :  { %v253_v51 = vmax.f32 %v176_v50, 0.0  ;;  %v179_v52 = vpop.f32.mrb[10].mxu0  ;;  %1484 = vmatpush3.bf16.msra.mxu1 %v1449_v60 }
 0x10c   :  { %v180_v54 = vadd.f32 %v179_v52, %v1943_v6  ;;  %v181_v55 = vpop.f32.mrb[11].mxu0  ;;  %1486 = vmatprep.subr.bf16.mxu1 %v1936_v63 }
 0x10d   :  { %v182_v56 = vadd.f32 %v181_v55, %v1945_v7  ;;  %397 = vmatprep.mubr.f32.mxu1 %v253_v51 }
 0x10e   :  { %398 = vmatmul.mubr.f32.gmra.mrb[8].mxu1 %v252_v53  ;;  %v254_v59 = vmax.f32 %v180_v54, 0.0 }
 0x10f   :  { %v255_v57 = vmax.f32 %v182_v56, 0.0  ;;  %v185_v58 = vpop.f32.mrb[12].mxu0  ;;  %1488 = vmatpush3.bf16.msra.mxu1 %v1936_v63 }
 0x110   :  { %v186_v61 = vadd.f32 %v185_v58, %v1943_v6  ;;  %v187_v62 = vpop.f32.mrb[13].mxu0 }
 0x111   :  { %v188_v60 = vadd.f32 %v187_v62, %v1945_v7  ;;  %402 = vmatprep.mubr.f32.mxu1 %v255_v57 }
 0x112   :  { %403 = vmatmul.mubr.f32.gmra.mrb[10].mxu1 %v254_v59  ;;  %v256_v2 = vmax.f32 %v186_v61, 0.0 }
 0x113   :  { %v257_v0 = vmax.f32 %v188_v60, 0.0  ;;  %v191_v1 = vpop.f32.mrb[14].mxu0 }
 0x114   :  { %v192_v4 = vadd.f32 %v191_v1, %v1943_v6  ;;  %v193_v5 = vpop.f32.mrb[15].mxu0 }
 0x115   :  { %v194_v8 = vadd.f32 %v193_v5, %v1945_v7  ;;  %407 = vmatprep.mubr.f32.mxu1 %v257_v0 }
 0x116   :  { %408 = vmatmul.mubr.f32.gmra.mrb[12].mxu1 %v256_v2  ;;  %v258_v10 = vmax.f32 %v192_v4, 0.0 }
 0x117   :  { %v259_v9 = vmax.f32 %v194_v8, 0.0  ;;  %v197_v63 = vpop.f32.mrb[16].mxu0 }
 0x118   :  { %v198_v11 = vadd.f32 %v197_v63, %v1943_v6  ;;  %v199_v12 = vpop.f32.mrb[17].mxu0 }
 0x119   :  { %v200_v13 = vadd.f32 %v199_v12, %v1945_v7  ;;  %412 = vmatprep.mubr.f32.mxu1 %v259_v9  ;;  %v484_v12 = vld [vmem:[%s2383_s5 + $0x50] sm:$0xff] }
 0x11a   :  { %413 = vmatmul.mubr.f32.gmra.mrb[14].mxu1 %v258_v10  ;;  %v260_v16 = vmax.f32 %v198_v11, 0.0 }
 0x11b   :  { %v261_v14 = vmax.f32 %v200_v13, 0.0  ;;  %v203_v15 = vpop.f32.mrb[18].mxu0  ;;  %v485_v13 = vld [vmem:[%s2383_s5 + $0x58] sm:$0xff] }
 0x11c   :  { %v204_v18 = vadd.f32 %v203_v15, %v1943_v6  ;;  %v205_v19 = vpop.f32.mrb[19].mxu0 }
 0x11d   :  { %v206_v20 = vadd.f32 %v205_v19, %v1945_v7  ;;  %417 = vmatprep.mubr.f32.mxu1 %v261_v14  ;;  %v1457_v14 = vpack.c.bf16 %v485_v13, %v484_v12 }
 0x11e   :  { %418 = vmatmul.mubr.f32.gmra.mrb[16].mxu1 %v260_v16  ;;  %v262_v23 = vmax.f32 %v204_v18, 0.0  ;;  %v488_v16 = vld [vmem:[%s2383_s5 + $0x70] sm:$0xff]  ;;  %v489_v18 = vld [vmem:[%s2383_s5 + $0x78] sm:$0xff] }
 0x11f   :  { %v263_v21 = vmax.f32 %v206_v20, 0.0  ;;  %v209_v22 = vpop.f32.mrb[20].mxu0  ;;  %1458 = vmatprep.subr.bf16.mxu0 %v1457_v14  ;;  %1490 = vmatprep.subr.bf16.mxu1 %v1457_v14  ;;  %v1465_v19 = vpack.c.bf16 %v489_v18, %v488_v16 }
 0x120   :  { %v210_v25 = vadd.f32 %v209_v22, %v1943_v6  ;;  %v211_v26 = vpop.f32.mrb[21].mxu0  ;;  %1460 = vmatpush3.bf16.msra.mxu0 %v1457_v14  ;;  %1492 = vmatpush3.bf16.msra.mxu1 %v1457_v14 }
 0x121   :  { %v212_v41 = vadd.f32 %v211_v26, %v1945_v7  ;;  %422 = vmatprep.mubr.f32.mxu1 %v263_v21  ;;  %v2002_v21 = vld [vmem:[%s2385_s4] ss:$0 sm:$0xff] }
 0x122   :  { %423 = vmatmul.mubr.f32.gmra.mrb[18].mxu1 %v262_v23  ;;  %v264_v3 = vmax.f32 %v210_v25, 0.0 }
 0x123   :  { %v265_v42 = vmax.f32 %v212_v41, 0.0  ;;  %v215_v43 = vpop.f32.mrb[22].mxu0 }
 0x124   :  { %v216_v44 = vadd.f32 %v215_v43, %v1943_v6  ;;  %v217_v45 = vpop.f32.mrb[23].mxu0 }
 0x125   :  { %v218_v46 = vadd.f32 %v217_v45, %v1945_v7  ;;  %427 = vmatprep.mubr.f32.mxu1 %v265_v42 }
 0x126   :  { %428 = vmatmul.mubr.f32.gmra.mrb[20].mxu1 %v264_v3  ;;  %v266_v49 = vmax.f32 %v216_v44, 0.0 }
 0x127   :  { %v267_v47 = vmax.f32 %v218_v46, 0.0  ;;  %v221_v48 = vpop.f32.mrb[24].mxu0 }
 0x128   :  { %v222_v50 = vadd.f32 %v221_v48, %v1943_v6  ;;  %v223_v51 = vpop.f32.mrb[25].mxu0 }
 0x129   :  { %v224_v52 = vadd.f32 %v223_v51, %v1945_v7  ;;  %432 = vmatprep.mubr.f32.mxu1 %v267_v47 }
 0x12a   :  { %433 = vmatmul.mubr.f32.gmra.mrb[22].mxu1 %v266_v49  ;;  %v268_v55 = vmax.f32 %v222_v50, 0.0 }
 0x12b   :  { %v269_v53 = vmax.f32 %v224_v52, 0.0  ;;  %v227_v54 = vpop.f32.mrb[26].mxu0 }
 0x12c   :  { %v228_v56 = vadd.f32 %v227_v54, %v1943_v6  ;;  %v229_v57 = vpop.f32.mrb[27].mxu0 }
 0x12d   :  { %v230_v58 = vadd.f32 %v229_v57, %v1945_v7  ;;  %437 = vmatprep.mubr.f32.mxu1 %v269_v53 }
 0x12e   :  { %438 = vmatmul.mubr.f32.gmra.mrb[24].mxu1 %v268_v55  ;;  %v270_v62 = vmax.f32 %v228_v56, 0.0 }
 0x12f   :  { %v271_v59 = vmax.f32 %v230_v58, 0.0  ;;  %v233_v61 = vpop.f32.mrb[28].mxu0 }
 0x130   :  { %v234_v60 = vadd.f32 %v233_v61, %v1943_v6  ;;  %v235_v0 = vpop.f32.mrb[29].mxu0 }
 0x131   :  { %v236_v1 = vadd.f32 %v235_v0, %v1945_v7  ;;  %442 = vmatprep.mubr.f32.mxu1 %v271_v59 }
 0x132   :  { %443 = vmatmul.mubr.f32.gmra.mrb[26].mxu1 %v270_v62  ;;  %v272_v5 = vmax.f32 %v234_v60, 0.0 }
 0x133   :  { %v273_v2 = vmax.f32 %v236_v1, 0.0  ;;  %v239_v4 = vpop.f32.mrb[30].mxu0 }
 0x134   :  { %v240_v8 = vadd.f32 %v239_v4, %v1943_v6  ;;  %v241_v9 = vpop.f32.mrb[31].mxu0  ;;  %v486_v6 = vld [vmem:[%s2383_s5 + $0x60] sm:$0xff] }
 0x135   :  { %v242_v63 = vadd.f32 %v241_v9, %v1945_v7  ;;  %447 = vmatprep.mubr.f32.mxu1 %v273_v2  ;;  %v487_v7 = vld [vmem:[%s2383_s5 + $0x68] sm:$0xff] }
 0x136   :  { %448 = vmatmul.mubr.f32.gmra.mrb[28].mxu1 %v272_v5  ;;  %v274_v11 = vmax.f32 %v240_v8, 0.0  ;;  %v1461_v15 = vpack.c.bf16 %v487_v7, %v486_v6 }
 0x137   :  { %v275_v10 = vmax.f32 %v242_v63, 0.0 }
 0x138   :  { %1462 = vmatprep.subr.bf16.mxu0 %v1461_v15  ;;  %1494 = vmatprep.subr.bf16.mxu1 %v1461_v15 }
 0x139   :  { %452 = vmatprep.mubr.f32.mxu1 %v275_v10  ;;  %1464 = vmatpush3.bf16.msra.mxu0 %v1461_v15 }
 0x13a   :  { %453 = vmatmul.mubr.f32.gmra.mrb[30].mxu1 %v274_v11  ;;  %1466 = vmatprep.subr.bf16.mxu0 %v1465_v19 }
 0x13b   :  { %1496 = vmatpush3.bf16.msra.mxu1 %v1461_v15 }
 0x13c   :  { %1498 = vmatprep.subr.bf16.mxu1 %v1465_v19 }
 0x13d   :  { %1468 = vmatpush3.bf16.msra.mxu0 %v1465_v19 }
 0x13f   :  { %1500 = vmatpush3.bf16.msra.mxu1 %v1465_v19 }
 0x1d1   :  { %v1149_v20 = vpop.f32.mrb[0].mxu1 }
 0x1d2   :  { %v1150_v22 = vpop.f32.mrb[1].mxu1 }
 0x1d3   :  { %v1151_v23 = vadd.f32 %v1150_v22, %v1149_v20 }
 0x1d5   :  { %v380_v25 = vadd.f32 %v1151_v23, %v2002_v21  ;;  %v1152_v26 = vpop.f32.mrb[2].mxu1 }
 0x1d6   :  { %v1153_v41 = vpop.f32.mrb[3].mxu1 }
 0x1d7   :  { %v1154_v42 = vadd.f32 %v1153_v41, %v1152_v26  ;;  %v2006_v43 = vadd.f32 %v380_v25, %v1768_v17 }
 0x1d9   :  { %v385_v3 = vadd.f32 %v1154_v42, %v2002_v21  ;;  %v1155_v44 = vpop.f32.mrb[4].mxu1  ;;  %1293 = vmatprep.mubr.f32.mxu0 %v2006_v43 }
 0x1da   :  { %v1156_v45 = vpop.f32.mrb[5].mxu1 }
 0x1db   :  { %v2011_v46 = vadd.f32 %v385_v3, %v1787_v24  ;;  %v1157_v47 = vadd.f32 %v1156_v45, %v1155_v44 }
 0x1dd   :  { %v390_v48 = vadd.f32 %v1157_v47, %v2002_v21  ;;  %v1158_v49 = vpop.f32.mrb[6].mxu1  ;;  %1294 = vmatmul.mubr.f32.vlgmr.msra.gmra.mrb[32].mxu0 %v2011_v46 }
 0x1de   :  { %v1159_v50 = vpop.f32.mrb[7].mxu1 }
 0x1df   :  { %v1160_v51 = vadd.f32 %v1159_v50, %v1158_v49  ;;  %v2016_v17 = vadd.f32 %v390_v48, %v1794_v27 }
 0x1e1   :  { %v395_v52 = vadd.f32 %v1160_v51, %v2002_v21  ;;  %v1161_v53 = vpop.f32.mrb[8].mxu1  ;;  %1296 = vmatprep.mubr.f32.mxu0 %v2016_v17 }
 0x1e2   :  { %v1162_v54 = vpop.f32.mrb[9].mxu1 }
 0x1e3   :  { %v1163_v55 = vadd.f32 %v1162_v54, %v1161_v53  ;;  %v2021_v24 = vadd.f32 %v395_v52, %v1801_v28 }
 0x1e5   :  { %v400_v56 = vadd.f32 %v1163_v55, %v2002_v21  ;;  %v1164_v57 = vpop.f32.mrb[10].mxu1  ;;  %1297 = vmatmul.mubr.f32.gmra.mrb[34].mxu0 %v2021_v24 }
 0x1e6   :  { %v1165_v58 = vpop.f32.mrb[11].mxu1 }
 0x1e7   :  { %v1166_v59 = vadd.f32 %v1165_v58, %v1164_v57  ;;  %v2026_v27 = vadd.f32 %v400_v56, %v1808_v29 }
 0x1e9   :  { %v405_v61 = vadd.f32 %v1166_v59, %v2002_v21  ;;  %v1167_v62 = vpop.f32.mrb[12].mxu1  ;;  %1299 = vmatprep.mubr.f32.mxu0 %v2026_v27 }
 0x1ea   :  { %v1168_v60 = vpop.f32.mrb[13].mxu1 }
 0x1eb   :  { %v1169_v0 = vadd.f32 %v1168_v60, %v1167_v62  ;;  %v2031_v28 = vadd.f32 %v405_v61, %v1815_v30 }
 0x1ed   :  { %v410_v1 = vadd.f32 %v1169_v0, %v2002_v21  ;;  %v1170_v2 = vpop.f32.mrb[14].mxu1  ;;  %1300 = vmatmul.mubr.f32.gmra.mrb[36].mxu0 %v2031_v28 }
 0x1ee   :  { %v1171_v4 = vpop.f32.mrb[15].mxu1 }
 0x1ef   :  { %v1172_v5 = vadd.f32 %v1171_v4, %v1170_v2  ;;  %v2036_v29 = vadd.f32 %v410_v1, %v1822_v31 }
 0x1f1   :  { %v415_v8 = vadd.f32 %v1172_v5, %v2002_v21  ;;  %v1173_v9 = vpop.f32.mrb[16].mxu1  ;;  %1302 = vmatprep.mubr.f32.mxu0 %v2036_v29 }
 0x1f2   :  { %v1174_v63 = vpop.f32.mrb[17].mxu1 }
 0x1f3   :  { %v1175_v10 = vadd.f32 %v1174_v63, %v1173_v9  ;;  %v2041_v30 = vadd.f32 %v415_v8, %v1829_v32 }
 0x1f5   :  { %v420_v11 = vadd.f32 %v1175_v10, %v2002_v21  ;;  %v1176_v12 = vpop.f32.mrb[18].mxu1  ;;  %1303 = vmatmul.mubr.f32.gmra.mrb[38].mxu0 %v2041_v30 }
 0x1f6   :  { %v1177_v13 = vpop.f32.mrb[19].mxu1 }
 0x1f7   :  { %v1178_v14 = vadd.f32 %v1177_v13, %v1176_v12  ;;  %v2046_v31 = vadd.f32 %v420_v11, %v1836_v33 }
 0x1f9   :  { %v425_v6 = vadd.f32 %v1178_v14, %v2002_v21  ;;  %v1179_v7 = vpop.f32.mrb[20].mxu1  ;;  %1305 = vmatprep.mubr.f32.mxu0 %v2046_v31 }
 0x1fa   :  { %v1180_v15 = vpop.f32.mrb[21].mxu1 }
 0x1fb   :  { %v1181_v16 = vadd.f32 %v1180_v15, %v1179_v7  ;;  %v2051_v32 = vadd.f32 %v425_v6, %v1843_v34 }
 0x1fd   :  { %v430_v18 = vadd.f32 %v1181_v16, %v2002_v21  ;;  %v1182_v19 = vpop.f32.mrb[22].mxu1  ;;  %1306 = vmatmul.mubr.f32.gmra.mrb[40].mxu0 %v2051_v32 }
 0x1fe   :  { %v1183_v20 = vpop.f32.mrb[23].mxu1 }
 0x1ff   :  { %v1184_v22 = vadd.f32 %v1183_v20, %v1182_v19  ;;  %v2056_v33 = vadd.f32 %v430_v18, %v1850_v35 }
 0x201   :  { %v435_v23 = vadd.f32 %v1184_v22, %v2002_v21  ;;  %v1185_v25 = vpop.f32.mrb[24].mxu1  ;;  %1308 = vmatprep.mubr.f32.mxu0 %v2056_v33 }
 0x202   :  { %v1186_v26 = vpop.f32.mrb[25].mxu1 }
 0x203   :  { %v1187_v41 = vadd.f32 %v1186_v26, %v1185_v25  ;;  %v2061_v34 = vadd.f32 %v435_v23, %v1857_v36 }
 0x205   :  { %v440_v42 = vadd.f32 %v1187_v41, %v2002_v21  ;;  %v1188_v3 = vpop.f32.mrb[26].mxu1  ;;  %1309 = vmatmul.mubr.f32.gmra.mrb[42].mxu0 %v2061_v34 }
 0x206   :  { %v1189_v44 = vpop.f32.mrb[27].mxu1 }
 0x207   :  { %v1190_v45 = vadd.f32 %v1189_v44, %v1188_v3  ;;  %v2066_v35 = vadd.f32 %v440_v42, %v1864_v37 }
 0x209   :  { %v445_v47 = vadd.f32 %v1190_v45, %v2002_v21  ;;  %v1191_v48 = vpop.f32.mrb[28].mxu1  ;;  %1311 = vmatprep.mubr.f32.mxu0 %v2066_v35 }
 0x20a   :  { %v1192_v49 = vpop.f32.mrb[29].mxu1 }
 0x20b   :  { %v1193_v50 = vadd.f32 %v1192_v49, %v1191_v48  ;;  %v2071_v36 = vadd.f32 %v445_v47, %v1871_v38 }
 0x20d   :  { %v450_v51 = vadd.f32 %v1193_v50, %v2002_v21  ;;  %v1194_v52 = vpop.f32.mrb[30].mxu1  ;;  %1312 = vmatmul.mubr.f32.gmra.mrb[44].mxu0 %v2071_v36 }
 0x20e   :  { %v1195_v53 = vpop.f32.mrb[31].mxu1 }
 0x20f   :  { %v1196_v54 = vadd.f32 %v1195_v53, %v1194_v52  ;;  %v2076_v37 = vadd.f32 %v450_v51, %v1878_v39 }
 0x211   :  { %v455_v55 = vadd.f32 %v1196_v54, %v2002_v21  ;;  %1314 = vmatprep.mubr.f32.mxu0 %v2076_v37 }
 0x213   :  { %v2081_v56 = vadd.f32 %v455_v55, %v1885_v40 }
 0x215   :  { %1315 = vmatmul.mubr.f32.gmra.mrb[46].mxu0 %v2081_v56 }
 0x2b0   :  { %v1295_v38 = vpop.f32.mrb[32].mxu0 }
 0x2b1   :  { %v636_v57 = vmul.f32 0.03125, %v1295_v38  ;;  %v556_v58 = vpop.f32.mrb[33].mxu0 }
 0x2b2   :  { %v635_v59 = vmul.f32 0.03125, %v556_v58 }
 0x2b3   :  { %v2085_v61 = vsub.f32 %v2011_v46, %v636_v57 }
 0x2b4   :  { %v2088_v62 = vsub.f32 %v2006_v43, %v635_v59 }
 0x2b5   :  { %v668_v21 = vmul.f32 %v2085_v61, %v2085_v61 }
 0x2b6   :  { %v667_v39 = vmul.f32 %v2088_v62, %v2088_v62 }
 0x2b8   :  { %v1298_v40 = vpop.f32.mrb[34].mxu0  ;;  %1349 = vmatprep.mubr.f32.mxu1 %v667_v39 }
 0x2b9   :  { %v638_v60 = vmul.f32 0.03125, %v1298_v40  ;;  %v566_v0 = vpop.f32.mrb[35].mxu0  ;;  %1350 = vmatmul.mubr.f32.vlgmr.msra.gmra.mrb[32].mxu1 %v668_v21 }
 0x2ba   :  { %v637_v1 = vmul.f32 0.03125, %v566_v0 }
 0x2bb   :  { %v2095_v2 = vsub.f32 %v2021_v24, %v638_v60 }
 0x2bc   :  { %v2098_v46 = vsub.f32 %v2016_v17, %v637_v1 }
 0x2bd   :  { %v670_v4 = vmul.f32 %v2095_v2, %v2095_v2 }
 0x2be   :  { %v669_v43 = vmul.f32 %v2098_v46, %v2098_v46 }
 0x2c0   :  { %v1301_v5 = vpop.f32.mrb[36].mxu0  ;;  %1352 = vmatprep.mubr.f32.mxu1 %v669_v43 }
 0x2c1   :  { %v640_v8 = vmul.f32 0.03125, %v1301_v5  ;;  %v576_v9 = vpop.f32.mrb[37].mxu0  ;;  %1353 = vmatmul.mubr.f32.gmra.mrb[34].mxu1 %v670_v4 }
 0x2c2   :  { %v639_v63 = vmul.f32 0.03125, %v576_v9 }
 0x2c3   :  { %v2105_v10 = vsub.f32 %v2031_v28, %v640_v8 }
 0x2c4   :  { %v2108_v24 = vsub.f32 %v2026_v27, %v639_v63 }
 0x2c5   :  { %v672_v11 = vmul.f32 %v2105_v10, %v2105_v10 }
 0x2c6   :  { %v671_v17 = vmul.f32 %v2108_v24, %v2108_v24 }
 0x2c8   :  { %v1304_v12 = vpop.f32.mrb[38].mxu0  ;;  %1355 = vmatprep.mubr.f32.mxu1 %v671_v17 }
 0x2c9   :  { %v642_v13 = vmul.f32 0.03125, %v1304_v12  ;;  %v586_v14 = vpop.f32.mrb[39].mxu0  ;;  %1356 = vmatmul.mubr.f32.gmra.mrb[36].mxu1 %v672_v11 }
 0x2ca   :  { %v641_v6 = vmul.f32 0.03125, %v586_v14 }
 0x2cb   :  { %v2115_v7 = vsub.f32 %v2041_v30, %v642_v13 }
 0x2cc   :  { %v2118_v28 = vsub.f32 %v2036_v29, %v641_v6 }
 0x2cd   :  { %v674_v15 = vmul.f32 %v2115_v7, %v2115_v7 }
 0x2ce   :  { %v673_v27 = vmul.f32 %v2118_v28, %v2118_v28 }
 0x2d0   :  { %v1307_v16 = vpop.f32.mrb[40].mxu0  ;;  %1358 = vmatprep.mubr.f32.mxu1 %v673_v27 }
 0x2d1   :  { %v644_v18 = vmul.f32 0.03125, %v1307_v16  ;;  %v596_v19 = vpop.f32.mrb[41].mxu0  ;;  %1359 = vmatmul.mubr.f32.gmra.mrb[38].mxu1 %v674_v15 }
 0x2d2   :  { %v643_v20 = vmul.f32 0.03125, %v596_v19 }
 0x2d3   :  { %v2125_v22 = vsub.f32 %v2051_v32, %v644_v18 }
 0x2d4   :  { %v2128_v30 = vsub.f32 %v2046_v31, %v643_v20 }
 0x2d5   :  { %v676_v23 = vmul.f32 %v2125_v22, %v2125_v22 }
 0x2d6   :  { %v675_v29 = vmul.f32 %v2128_v30, %v2128_v30 }
 0x2d8   :  { %v1310_v25 = vpop.f32.mrb[42].mxu0  ;;  %1361 = vmatprep.mubr.f32.mxu1 %v675_v29 }
 0x2d9   :  { %v646_v26 = vmul.f32 0.03125, %v1310_v25  ;;  %v606_v41 = vpop.f32.mrb[43].mxu0  ;;  %1362 = vmatmul.mubr.f32.gmra.mrb[40].mxu1 %v676_v23 }
 0x2da   :  { %v645_v42 = vmul.f32 0.03125, %v606_v41 }
 0x2db   :  { %v2135_v3 = vsub.f32 %v2061_v34, %v646_v26 }
 0x2dc   :  { %v2138_v32 = vsub.f32 %v2056_v33, %v645_v42 }
 0x2dd   :  { %v678_v44 = vmul.f32 %v2135_v3, %v2135_v3 }
 0x2de   :  { %v677_v31 = vmul.f32 %v2138_v32, %v2138_v32 }
 0x2e0   :  { %v1313_v45 = vpop.f32.mrb[44].mxu0  ;;  %1364 = vmatprep.mubr.f32.mxu1 %v677_v31 }
 0x2e1   :  { %v648_v47 = vmul.f32 0.03125, %v1313_v45  ;;  %v616_v48 = vpop.f32.mrb[45].mxu0  ;;  %1365 = vmatmul.mubr.f32.gmra.mrb[42].mxu1 %v678_v44 }
 0x2e2   :  { %v647_v49 = vmul.f32 0.03125, %v616_v48 }
 0x2e3   :  { %v2145_v50 = vsub.f32 %v2071_v36, %v648_v47 }
 0x2e4   :  { %v2148_v34 = vsub.f32 %v2066_v35, %v647_v49 }
 0x2e5   :  { %v680_v51 = vmul.f32 %v2145_v50, %v2145_v50 }
 0x2e6   :  { %v679_v33 = vmul.f32 %v2148_v34, %v2148_v34 }
 0x2e8   :  { %v1316_v52 = vpop.f32.mrb[46].mxu0  ;;  %1367 = vmatprep.mubr.f32.mxu1 %v679_v33 }
 0x2e9   :  { %v650_v53 = vmul.f32 0.03125, %v1316_v52  ;;  %v626_v54 = vpop.f32.mrb[47].mxu0  ;;  %1368 = vmatmul.mubr.f32.gmra.mrb[44].mxu1 %v680_v51 }
 0x2ea   :  { %v649_v55 = vmul.f32 0.03125, %v626_v54 }
 0x2eb   :  { %v2155_v38 = vsub.f32 %v2081_v56, %v650_v53 }
 0x2ec   :  { %v2158_v36 = vsub.f32 %v2076_v37, %v649_v55 }
 0x2ed   :  { %v682_v57 = vmul.f32 %v2155_v38, %v2155_v38 }
 0x2ee   :  { %v681_v35 = vmul.f32 %v2158_v36, %v2158_v36 }
 0x2f0   :  { %1370 = vmatprep.mubr.f32.mxu1 %v681_v35 }
 0x2f1   :  { %1371 = vmatmul.mubr.f32.gmra.mrb[46].mxu1 %v682_v57 }
 0x38c   :  { %v1351_v58 = vpop.f32.mrb[32].mxu1 }
 0x38d   :  { %v829_v59 = vmul.f32 0.032258064, %v1351_v58  ;;  %v749_v39 = vpop.f32.mrb[33].mxu1 }
 0x38e   :  { %v828_v21 = vmul.f32 0.032258064, %v749_v39 }
 0x38f   :  { %1502 = vrsqrt.f32 %v829_v59  ;;  %vm853_vm0 = vcmp.eq.f32.partialorder %v829_v59, inf  ;;  %v856_v4 = vand.u32 2147483648, %v829_v59  ;;  %vm855_vm1 = vcmp.eq.f32.partialorder %v829_v59, 0.0 }
 0x390   :  { %1504 = vrsqrt.f32 %v828_v21  ;;  %vm846_vm2 = vcmp.eq.f32.partialorder %v828_v21, inf  ;;  %v849_v9 = vand.u32 2147483648, %v828_v21  ;;  %vm848_vm3 = vcmp.eq.f32.partialorder %v828_v21, 0.0 }
 0x394   :  { %v1354_v40 = vpop.f32.mrb[34].mxu1 }
 0x395   :  { %v831_v56 = vmul.f32 0.032258064, %v1354_v40  ;;  %v759_v60 = vpop.f32.mrb[35].mxu1 }
 0x396   :  { %v830_v0 = vmul.f32 0.032258064, %v759_v60 }
 0x397   :  { %1506 = vrsqrt.f32 %v831_v56  ;;  %vm867_vm4 = vcmp.eq.f32.partialorder %v831_v56, inf  ;;  %v870_v20 = vand.u32 2147483648, %v831_v56  ;;  %vm869_vm5 = vcmp.eq.f32.partialorder %v831_v56, 0.0 }
 0x398   :  { %1508 = vrsqrt.f32 %v830_v0  ;;  %vm860_vm6 = vcmp.eq.f32.partialorder %v830_v0, inf  ;;  %v863_v25 = vand.u32 2147483648, %v830_v0  ;;  %vm862_vm7 = vcmp.eq.f32.partialorder %v830_v0, 0.0 }
 0x399   :  { %v1503_v37 = vpop.eup %1502 }
 0x39a   :  { %v1505_v1 = vpop.eup %1504  ;;  %v852_v43 = vmul.f32 %v1503_v37, %v829_v59 }
 0x39b   :  { %v845_v5 = vmul.f32 %v1505_v1, %v828_v21 }
 0x39c   :  { %v854_v8 = vsel %vm853_vm0, %v829_v59, %v852_v43  ;;  %v1357_v63 = vpop.f32.mrb[36].mxu1 }
 0x39d   :  { %v857_v17 = vsel %vm855_vm1, %v856_v4, %v854_v8  ;;  %v847_v11 = vsel %vm846_vm2, %v828_v21, %v845_v5  ;;  %v833_v12 = vmul.f32 0.032258064, %v1357_v63  ;;  %v769_v13 = vpop.f32.mrb[37].mxu1  ;;  %v2180_v8 = vld [vmem:[%s2385_s4 + $0x1] ss:$0 sm:$0xff] }
 0x39e   :  { %v957_v14 = vadd.f32 0.001, %v857_v17  ;;  %v850_v6 = vsel %vm848_vm3, %v849_v9, %v847_v11  ;;  %v832_v27 = vmul.f32 0.032258064, %v769_v13 }
 0x39f   :  { %v956_v15 = vadd.f32 0.001, %v850_v6  ;;  %1510 = vrsqrt.f32 %v833_v12  ;;  %vm881_vm8 = vcmp.eq.f32.partialorder %v833_v12, inf  ;;  %v884_v55 = vand.u32 2147483648, %v833_v12 }
 0x3a0   :  { %1512 = vrcp.f32 %v957_v14  ;;  %vm883_vm9 = vcmp.eq.f32.partialorder %v833_v12, 0.0  ;;  %vm874_vm10 = vcmp.eq.f32.partialorder %v832_v27, inf  ;;  %v877_v1 = vand.u32 2147483648, %v832_v27 }
 0x3a1   :  { %v1507_v16 = vpop.eup %1506  ;;  %1514 = vrcp.f32 %v956_v15  ;;  %vm876_vm11 = vcmp.eq.f32.partialorder %v832_v27, 0.0 }
 0x3a2   :  { %v1509_v18 = vpop.eup %1508  ;;  %v866_v19 = vmul.f32 %v1507_v16, %v831_v56  ;;  %1516 = vrsqrt.f32 %v832_v27 }
 0x3a3   :  { %v859_v29 = vmul.f32 %v1509_v18, %v830_v0 }
 0x3a4   :  { %v868_v23 = vsel %vm867_vm4, %v831_v56, %v866_v19  ;;  %v1360_v26 = vpop.f32.mrb[38].mxu1 }
 0x3a5   :  { %v871_v41 = vsel %vm869_vm5, %v870_v20, %v868_v23  ;;  %v861_v42 = vsel %vm860_vm6, %v830_v0, %v859_v29  ;;  %v2164_v31 = vmul.f32 0.032258064, %v1360_v26  ;;  %v779_v44 = vpop.f32.mrb[39].mxu1 }
 0x3a6   :  { %v959_v45 = vadd.f32 0.001, %v871_v41  ;;  %v864_v47 = vsel %vm862_vm7, %v863_v25, %v861_v42  ;;  %v2166_v48 = vmul.f32 0.032258064, %v779_v44 }
 0x3a7   :  { %v958_v49 = vadd.f32 0.001, %v864_v47  ;;  %1518 = vrsqrt.f32 %v2164_v31  ;;  %vm895_vm12 = vcmp.eq.f32.partialorder %v2164_v31, inf  ;;  %vm897_vm13 = vcmp.eq.f32.partialorder %v2164_v31, 0.0 }
 0x3a8   :  { %1520 = vrcp.f32 %v959_v45  ;;  %vm888_vm14 = vcmp.eq.f32.partialorder %v2166_v48, inf  ;;  %v891_v23 = vand.u32 2147483648, %v2166_v48  ;;  %vm890_vm15 = vcmp.eq.f32.partialorder %v2166_v48, 0.0 }
 0x3a9   :  { %v1511_v33 = vpop.eup %1510  ;;  %1522 = vrcp.f32 %v958_v49 }
 0x3aa   :  { %v1513_v51 = vpop.eup %1512  ;;  %v880_v52 = vmul.f32 %v1511_v33, %v833_v12  ;;  %1524 = vrsqrt.f32 %v2166_v48 }
 0x3ab   :  { %v1515_v53 = vpop.eup %1514  ;;  %v989_v54 = vmul.f32 %v1513_v51, %v957_v14  ;;  %v2191_v14 = vld [vmem:[%s2385_s4 + $0x2] ss:$0 sm:$0xff] }
 0x3ac   :  { %v1517_v35 = vpop.eup %1516  ;;  %v988_v57 = vmul.f32 %v1515_v53, %v956_v15  ;;  %v882_v58 = vsel %vm881_vm8, %v833_v12, %v880_v52  ;;  %v1363_v59 = vpop.f32.mrb[40].mxu1 }
 0x3ad   :  { %v1005_v39 = vsub.f32 2.0, %v989_v54  ;;  %v885_v21 = vsel %vm883_vm9, %v884_v55, %v882_v58  ;;  %v873_v40 = vmul.f32 %v1517_v35, %v832_v27  ;;  %v2170_v56 = vmul.f32 0.032258064, %v1363_v59  ;;  %v789_v60 = vpop.f32.mrb[41].mxu1 }
 0x3ae   :  { %v1004_v0 = vsub.f32 2.0, %v988_v57  ;;  %v2172_v37 = vadd.f32 0.001, %v885_v21  ;;  %v2174_v43 = vmul.f32 0.032258064, %v789_v60 }
 0x3af   :  { %v1021_v4 = vmul.f32 %v1513_v51, %v1005_v39  ;;  %v875_v5 = vsel %vm874_vm10, %v832_v27, %v873_v40  ;;  %1526 = vrsqrt.f32 %v2170_v56  ;;  %vm909_vm0 = vcmp.eq.f32.partialorder %v2170_v56, inf }
 0x3b0   :  { %v1020_v9 = vmul.f32 %v1515_v53, %v1004_v0  ;;  %1528 = vrcp.f32 %v2172_v37  ;;  %v878_v63 = vsel %vm876_vm11, %v877_v1, %v875_v5  ;;  %vm911_vm1 = vcmp.eq.f32.partialorder %v2170_v56, 0.0 }
 0x3b1   :  { %v1519_v17 = vpop.eup %1518  ;;  %v1037_v11 = vmul.f32 %v1021_v4, %v2085_v61  ;;  %v2184_v12 = vadd.f32 0.001, %v878_v63  ;;  %1530 = vrsqrt.f32 %v2174_v43  ;;  %v898_v61 = vand.u32 2147483648, %v2164_v31 }
 0x3b2   :  { %v1521_v13 = vpop.eup %1520  ;;  %v1036_v6 = vmul.f32 %v1020_v9, %v2088_v62  ;;  %v894_v27 = vmul.f32 %v1519_v17, %v2164_v31  ;;  %v912_v21 = vand.u32 2147483648, %v2170_v56  ;;  %vm902_vm2 = vcmp.eq.f32.partialorder %v2174_v43, inf }
 0x3b3   :  { %v1523_v15 = vpop.eup %1522  ;;  %v1058_v16 = vmul.f32 %v2180_v8, %v1037_v11  ;;  %v991_v18 = vmul.f32 %v1521_v13, %v959_v45  ;;  %1532 = vrcp.f32 %v2184_v12  ;;  %vm904_vm3 = vcmp.eq.f32.partialorder %v2174_v43, 0.0 }
 0x3b4   :  { %v1525_v19 = vpop.eup %1524  ;;  %v1057_v20 = vmul.f32 %v2180_v8, %v1036_v6  ;;  %v990_v29 = vmul.f32 %v1523_v15, %v958_v49  ;;  %v896_v62 = vsel %vm895_vm12, %v2164_v31, %v894_v27  ;;  %v1366_v25 = vpop.f32.mrb[42].mxu1  ;;  %v905_v17 = vand.u32 2147483648, %v2174_v43 }
 0x3b5   :  { %v1079_v26 = vadd.f32 %v2191_v14, %v1058_v16  ;;  %v1007_v41 = vsub.f32 2.0, %v991_v18  ;;  %v899_v42 = vsel %vm897_vm13, %v898_v61, %v896_v62  ;;  %v887_v44 = vmul.f32 %v1525_v19, %v2166_v48  ;;  %v799_v45 = vpop.f32.mrb[43].mxu1 }
 0x3b6   :  { %v1078_v47 = vadd.f32 %v2191_v14, %v1057_v20  ;;  %v1006_v33 = vsub.f32 2.0, %v990_v29  ;;  %v963_v49 = vadd.f32 0.001, %v899_v42  ;;  %v2210_v51 = vmul.f32 0.032258064, %v1366_v25 }
 0x3b7   :  { %1095 = vst [vmem:[%s2386_s6 + $0x8] sm:$0xff] %v1079_v26  ;;  %v1023_v52 = vmul.f32 %v1521_v13, %v1007_v41  ;;  %v889_v53 = vsel %vm888_vm14, %v2166_v48, %v887_v44  ;;  %v2219_v31 = vmul.f32 0.032258064, %v799_v45 }
 0x3b8   :  { %1094 = vst [vmem:[%s2386_s6] sm:$0xff] %v1078_v47  ;;  %v1022_v54 = vmul.f32 %v1523_v15, %v1006_v33  ;;  %1534 = vrcp.f32 %v963_v49  ;;  %v892_v55 = vsel %vm890_vm15, %v891_v23, %v889_v53  ;;  %vm923_vm4 = vcmp.eq.f32.partialorder %v2210_v51, inf }
 0x3b9   :  { %v1527_v35 = vpop.eup %1526  ;;  %v1039_v57 = vmul.f32 %v1023_v52, %v2095_v2  ;;  %v2226_v58 = vadd.f32 0.001, %v892_v55  ;;  %1536 = vrsqrt.f32 %v2210_v51  ;;  %vm925_vm5 = vcmp.eq.f32.partialorder %v2210_v51, 0.0 }
 0x3ba   :  { %v1529_v48 = vpop.eup %1528  ;;  %v1038_v59 = vmul.f32 %v1022_v54, %v2098_v46  ;;  %v908_v39 = vmul.f32 %v1527_v35, %v2170_v56  ;;  %1538 = vrsqrt.f32 %v2219_v31  ;;  %v926_v62 = vand.u32 2147483648, %v2210_v51 }
 0x3bb   :  { %v1531_v40 = vpop.eup %1530  ;;  %v1060_v60 = vmul.f32 %v2180_v8, %v1039_v57  ;;  %v993_v2 = vmul.f32 %v1529_v48, %v2172_v37  ;;  %1540 = vrcp.f32 %v2226_v58  ;;  %vm916_vm6 = vcmp.eq.f32.partialorder %v2219_v31, inf }
 0x3bc   :  { %v1059_v0 = vmul.f32 %v2180_v8, %v1038_v59  ;;  %v910_v46 = vsel %vm909_vm0, %v2170_v56, %v908_v39  ;;  %v901_v1 = vmul.f32 %v1531_v40, %v2174_v43  ;;  %v1369_v4 = vpop.f32.mrb[44].mxu1  ;;  %vm918_vm7 = vcmp.eq.f32.partialorder %v2219_v31, 0.0 }
 0x3bd   :  { %v1533_v5 = vpop.eup %1532  ;;  %v1081_v9 = vadd.f32 %v2191_v14, %v1060_v60  ;;  %v1009_v63 = vsub.f32 2.0, %v993_v2  ;;  %v913_v37 = vsel %vm911_vm1, %v912_v21, %v910_v46  ;;  %v809_v11 = vpop.f32.mrb[45].mxu1  ;;  %v2254_v18 = vmul.f32 0.032258064, %v1369_v4 }
 0x3be   :  { %v1080_v13 = vadd.f32 %v2191_v14, %v1059_v0  ;;  %v992_v6 = vmul.f32 %v1533_v5, %v2184_v12  ;;  %v965_v27 = vadd.f32 0.001, %v913_v37  ;;  %v903_v61 = vsel %vm902_vm2, %v2174_v43, %v901_v1 }
 0x3bf   :  { %1097 = vst [vmem:[%s2386_s6 + $0x18] sm:$0xff] %v1081_v9  ;;  %v1025_v15 = vmul.f32 %v1529_v48, %v1009_v63  ;;  %v906_v16 = vsel %vm904_vm3, %v905_v17, %v903_v61  ;;  %v2256_v56 = vmul.f32 0.032258064, %v809_v11  ;;  %v919_v44 = vand.u32 2147483648, %v2219_v31 }
 0x3c0   :  { %1096 = vst [vmem:[%s2386_s6 + $0x10] sm:$0xff] %v1080_v13  ;;  %v1008_v19 = vsub.f32 2.0, %v992_v6  ;;  %1542 = vrcp.f32 %v965_v27  ;;  %v964_v12 = vadd.f32 0.001, %v906_v16  ;;  %vm937_vm8 = vcmp.eq.f32.partialorder %v2254_v18, inf }
 0x3c1   :  { %v1041_v20 = vmul.f32 %v1025_v15, %v2105_v10  ;;  %1544 = vrsqrt.f32 %v2254_v18  ;;  %vm939_vm9 = vcmp.eq.f32.partialorder %v2254_v18, 0.0  ;;  %v940_v13 = vand.u32 2147483648, %v2254_v18 }
 0x3c2   :  { %v1535_v43 = vpop.eup %1534  ;;  %v1024_v29 = vmul.f32 %v1533_v5, %v1008_v19  ;;  %1546 = vrcp.f32 %v964_v12  ;;  %vm930_vm10 = vcmp.eq.f32.partialorder %v2256_v56, inf  ;;  %v933_v19 = vand.u32 2147483648, %v2256_v56 }
 0x3c3   :  { %v1537_v23 = vpop.eup %1536  ;;  %v1062_v25 = vmul.f32 %v2180_v8, %v1041_v20  ;;  %v995_v26 = vmul.f32 %v1535_v43, %v963_v49  ;;  %1548 = vrsqrt.f32 %v2256_v56  ;;  %vm932_vm11 = vcmp.eq.f32.partialorder %v2256_v56, 0.0 }
 0x3c4   :  { %v1539_v10 = vpop.eup %1538  ;;  %v1040_v41 = vmul.f32 %v1024_v29, %v2108_v24  ;;  %v922_v42 = vmul.f32 %v1537_v23, %v2210_v51  ;;  %v1372_v45 = vpop.f32.mrb[46].mxu1 }
 0x3c5   :  { %v1541_v47 = vpop.eup %1540  ;;  %v1083_v33 = vadd.f32 %v2191_v14, %v1062_v25  ;;  %v1011_v52 = vsub.f32 2.0, %v995_v26  ;;  %v915_v49 = vmul.f32 %v1539_v10, %v2219_v31  ;;  %v2275_v53 = vmul.f32 0.032258064, %v1372_v45  ;;  %v819_v54 = vpop.f32.mrb[47].mxu1 }
 0x3c6   :  { %v1061_v55 = vmul.f32 %v2180_v8, %v1040_v41  ;;  %v994_v24 = vmul.f32 %v1541_v47, %v2226_v58  ;;  %v924_v35 = vsel %vm923_vm4, %v2210_v51, %v922_v42  ;;  %v2282_v57 = vmul.f32 0.032258064, %v819_v54 }
 0x3c7   :  { %1099 = vst [vmem:[%s2386_s6 + $0x28] sm:$0xff] %v1083_v33  ;;  %v1027_v48 = vmul.f32 %v1535_v43, %v1011_v52  ;;  %v927_v59 = vsel %vm925_vm5, %v926_v62, %v924_v35  ;;  %v917_v39 = vsel %vm916_vm6, %v2219_v31, %v915_v49  ;;  %1550 = vrsqrt.f32 %v2275_v53 }
 0x3c8   :  { %v1082_v58 = vadd.f32 %v2191_v14, %v1061_v55  ;;  %v1010_v21 = vsub.f32 2.0, %v994_v24  ;;  %v967_v40 = vadd.f32 0.001, %v927_v59  ;;  %v920_v60 = vsel %vm918_vm7, %v919_v44, %v917_v39 }
 0x3c9   :  { %v1043_v2 = vmul.f32 %v1027_v48, %v2115_v7  ;;  %v966_v0 = vadd.f32 0.001, %v920_v60  ;;  %vm951_vm12 = vcmp.eq.f32.partialorder %v2275_v53, inf  ;;  %vm953_vm13 = vcmp.eq.f32.partialorder %v2275_v53, 0.0 }
 0x3ca   :  { %v1543_v46 = vpop.eup %1542  ;;  %1098 = vst [vmem:[%s2386_s6 + $0x20] sm:$0xff] %v1082_v58  ;;  %v1026_v51 = vmul.f32 %v1541_v47, %v1010_v21  ;;  %1552 = vrcp.f32 %v967_v40  ;;  %vm944_vm14 = vcmp.eq.f32.partialorder %v2282_v57, inf  ;;  %v947_v48 = vand.u32 2147483648, %v2282_v57 }
 0x3cb   :  { %v1545_v1 = vpop.eup %1544  ;;  %v1064_v4 = vmul.f32 %v2180_v8, %v1043_v2  ;;  %v997_v5 = vmul.f32 %v1543_v46, %v965_v27  ;;  %1554 = vrcp.f32 %v966_v0  ;;  %vm946_vm15 = vcmp.eq.f32.partialorder %v2282_v57, 0.0 }
 0x3cc   :  { %v1547_v9 = vpop.eup %1546  ;;  %v1042_v31 = vmul.f32 %v1026_v51, %v2118_v28  ;;  %v936_v7 = vmul.f32 %v1545_v1, %v2254_v18  ;;  %1556 = vrsqrt.f32 %v2282_v57 }
 0x3cd   :  { %v1549_v63 = vpop.eup %1548  ;;  %v1085_v37 = vadd.f32 %v2191_v14, %v1064_v4  ;;  %v1013_v17 = vsub.f32 2.0, %v997_v5  ;;  %v996_v11 = vmul.f32 %v1547_v9, %v964_v12 }
 0x3ce   :  { %v1063_v6 = vmul.f32 %v2180_v8, %v1042_v31  ;;  %v938_v27 = vsel %vm937_vm8, %v2254_v18, %v936_v7  ;;  %v929_v61 = vmul.f32 %v1549_v63, %v2256_v56 }
 0x3cf   :  { %1101 = vst [vmem:[%s2386_s6 + $0x38] sm:$0xff] %v1085_v37  ;;  %v1029_v28 = vmul.f32 %v1543_v46, %v1013_v17  ;;  %v1012_v15 = vsub.f32 2.0, %v996_v11  ;;  %v941_v16 = vsel %vm939_vm9, %v940_v13, %v938_v27 }
 0x3d0   :  { %v1084_v12 = vadd.f32 %v2191_v14, %v1063_v6  ;;  %v969_v20 = vadd.f32 0.001, %v941_v16  ;;  %v931_v43 = vsel %vm930_vm10, %v2256_v56, %v929_v61  ;;  %v954_v56 = vand.u32 2147483648, %v2275_v53 }
 0x3d1   :  { %v1551_v18 = vpop.eup %1550  ;;  %v1045_v29 = vmul.f32 %v1029_v28, %v2125_v22  ;;  %v1028_v62 = vmul.f32 %v1547_v9, %v1012_v15  ;;  %v934_v23 = vsel %vm932_vm11, %v933_v19, %v931_v43 }
 0x3d2   :  { %1100 = vst [vmem:[%s2386_s6 + $0x30] sm:$0xff] %v1084_v12  ;;  %1558 = vrcp.f32 %v969_v20  ;;  %v968_v25 = vadd.f32 0.001, %v934_v23  ;;  %v950_v26 = vmul.f32 %v1551_v18, %v2275_v53 }
 0x3d3   :  { %v1066_v10 = vmul.f32 %v2180_v8, %v1045_v29  ;;  %v1044_v41 = vmul.f32 %v1028_v62, %v2128_v30 }
 0x3d4   :  { %v1553_v42 = vpop.eup %1552  ;;  %1560 = vrcp.f32 %v968_v25  ;;  %v952_v22 = vsel %vm951_vm12, %v2275_v53, %v950_v26 }
 0x3d5   :  { %v1555_v44 = vpop.eup %1554  ;;  %v1087_v45 = vadd.f32 %v2191_v14, %v1066_v10  ;;  %v1065_v47 = vmul.f32 %v2180_v8, %v1044_v41  ;;  %v999_v33 = vmul.f32 %v1553_v42, %v967_v40  ;;  %v955_v52 = vsel %vm953_vm13, %v954_v56, %v952_v22 }
 0x3d6   :  { %v1557_v49 = vpop.eup %1556  ;;  %v998_v54 = vmul.f32 %v1555_v44, %v966_v0  ;;  %v971_v30 = vadd.f32 0.001, %v955_v52 }
 0x3d7   :  { %1103 = vst [vmem:[%s2386_s6 + $0x48] sm:$0xff] %v1087_v45  ;;  %v1086_v55 = vadd.f32 %v2191_v14, %v1065_v47  ;;  %v1015_v24 = vsub.f32 2.0, %v999_v33  ;;  %v943_v35 = vmul.f32 %v1557_v49, %v2282_v57 }
 0x3d8   :  { %v1014_v53 = vsub.f32 2.0, %v998_v54  ;;  %1562 = vrcp.f32 %v971_v30 }
 0x3d9   :  { %1102 = vst [vmem:[%s2386_s6 + $0x40] sm:$0xff] %v1086_v55  ;;  %v1031_v59 = vmul.f32 %v1553_v42, %v1015_v24  ;;  %v945_v39 = vsel %vm944_vm14, %v2282_v57, %v943_v35 }
 0x3da   :  { %v1030_v58 = vmul.f32 %v1555_v44, %v1014_v53  ;;  %v948_v21 = vsel %vm946_vm15, %v947_v48, %v945_v39 }
 0x3db   :  { %v1047_v40 = vmul.f32 %v1031_v59, %v2135_v3  ;;  %v970_v60 = vadd.f32 0.001, %v948_v21 }
 0x3dc   :  { %v1559_v2 = vpop.eup %1558  ;;  %v1046_v0 = vmul.f32 %v1030_v58, %v2138_v32 }
 0x3dd   :  { %v1068_v46 = vmul.f32 %v2180_v8, %v1047_v40  ;;  %v1001_v51 = vmul.f32 %v1559_v2, %v969_v20  ;;  %1564 = vrcp.f32 %v970_v60 }
 0x3de   :  { %v1561_v1 = vpop.eup %1560  ;;  %v1067_v4 = vmul.f32 %v2180_v8, %v1046_v0 }
 0x3df   :  { %v1089_v5 = vadd.f32 %v2191_v14, %v1068_v46  ;;  %v1017_v9 = vsub.f32 2.0, %v1001_v51  ;;  %v1000_v31 = vmul.f32 %v1561_v1, %v968_v25 }
 0x3e0   :  { %v1088_v57 = vadd.f32 %v2191_v14, %v1067_v4 }
 0x3e1   :  { %1105 = vst [vmem:[%s2386_s6 + $0x58] sm:$0xff] %v1089_v5  ;;  %v1033_v3 = vmul.f32 %v1559_v2, %v1017_v9  ;;  %v1016_v7 = vsub.f32 2.0, %v1000_v31 }
 0x3e2   :  { %v1563_v32 = vpop.eup %1562  ;;  %1104 = vst [vmem:[%s2386_s6 + $0x50] sm:$0xff] %v1088_v57 }
 0x3e3   :  { %v1049_v63 = vmul.f32 %v1033_v3, %v2145_v50  ;;  %v1032_v37 = vmul.f32 %v1561_v1, %v1016_v7  ;;  %v1003_v17 = vmul.f32 %v1563_v32, %v971_v30 }
 0x3e5   :  { %v1070_v11 = vmul.f32 %v2180_v8, %v1049_v63  ;;  %v1048_v13 = vmul.f32 %v1032_v37, %v2148_v34  ;;  %v1019_v6 = vsub.f32 2.0, %v1003_v17 }
 0x3e7   :  { %v1565_v27 = vpop.eup %1564  ;;  %v1091_v61 = vadd.f32 %v2191_v14, %v1070_v11  ;;  %v1069_v28 = vmul.f32 %v2180_v8, %v1048_v13  ;;  %v1035_v15 = vmul.f32 %v1563_v32, %v1019_v6 }
 0x3e8   :  { %v1002_v16 = vmul.f32 %v1565_v27, %v970_v60 }
 0x3e9   :  { %1107 = vst [vmem:[%s2386_s6 + $0x68] sm:$0xff] %v1091_v61  ;;  %v1090_v50 = vadd.f32 %v2191_v14, %v1069_v28  ;;  %v1051_v19 = vmul.f32 %v1035_v15, %v2155_v38 }
 0x3ea   :  { %v1018_v12 = vsub.f32 2.0, %v1002_v16 }
 0x3eb   :  { %1106 = vst [vmem:[%s2386_s6 + $0x60] sm:$0xff] %v1090_v50  ;;  %v1072_v34 = vmul.f32 %v2180_v8, %v1051_v19 }
 0x3ec   :  { %v1034_v20 = vmul.f32 %v1565_v27, %v1018_v12 }
 0x3ed   :  { %v1093_v43 = vadd.f32 %v2191_v14, %v1072_v34 }
 0x3ee   :  { %v1050_v18 = vmul.f32 %v1034_v20, %v2158_v36 }
 0x3ef   :  { %1109 = vst [vmem:[%s2386_s6 + $0x78] sm:$0xff] %v1093_v43 }
 0x3f0   :  { %v1071_v29 = vmul.f32 %v2180_v8, %v1050_v18 }
 0x3f2   :  { %v1092_v38 = vadd.f32 %v2191_v14, %v1071_v29 }
 0x3f4   :  { %1108 = vst [vmem:[%s2386_s6 + $0x70] sm:$0xff] %v1092_v38 }

</bundles_post_ra>
